<compile_context>
chip_gen: v6e
topology: v6e:2x2x1
jax: 0.10.0
libtpu: 0.0.40
codegen_flags: <defaults>
</compile_context>

<pallas_src>
import math

import jax
import jax.numpy as jnp
from jax.experimental import pallas as pl
from jax.experimental.pallas import tpu as pltpu


# ----------------------------------------------------------------------------------
# Fused whole-model kernel: encoder -> reparam -> head -> Bayesian trunk -> sigmoid.
# All weights live in VMEM for the duration of the call; activations stay on-chip.
# ----------------------------------------------------------------------------------
def _fused_forward_kernel(x_ref, leps_ref,
                          ew0_ref, eb0_ref, ew1_ref, eb1_ref, ew2_ref, eb2_ref,
                          hw0_ref, hb0_ref, hw1_ref, hb1_ref,
                          sw0_ref, sb0_ref, sw1_ref, sb1_ref,
                          y_ref, mean_ref, logvar_ref):
    bf16 = jnp.bfloat16

    def linear(a_bf16, w_ref, b_ref):
        # bf16 x bf16 MXU matmul, f32 accumulation, f32 bias row added once.
        return jnp.dot(a_bf16, w_ref[...], preferred_element_type=jnp.float32) + b_ref[...]

    def relu(v):
        return jnp.maximum(v, 0.0)

    # ---- Encoder MLP (Linear->ReLU->Linear->ReLU->Linear) ------------------------
    h = relu(linear(x_ref[...], ew0_ref, eb0_ref))
    h = relu(linear(h.astype(bf16), ew1_ref, eb1_ref))
    stats = linear(h.astype(bf16), ew2_ref, eb2_ref)          # (tm, 2*latent_dim), f32

    latent_dim = mean_ref.shape[1]
    mean = stats[:, :latent_dim]
    log_var = stats[:, latent_dim:]
    mean_ref[...] = mean
    logvar_ref[...] = log_var

    # ---- VAE latent reparameterization (eps streamed in) -------------------------
    z = mean + jnp.exp(0.5 * log_var) * leps_ref[...]

    # ---- Head MLP (module applies an extra F.relu after the head Sequential) -----
    h = relu(linear(z.astype(bf16), hw0_ref, hb0_ref))
    h = relu(linear(h.astype(bf16), hw1_ref, hb1_ref))

    # ---- Shared Bayesian trunk (weights already reparameterized per forward) -----
    h = relu(linear(h.astype(bf16), sw0_ref, sb0_ref))
    logits = linear(h.astype(bf16), sw1_ref, sb1_ref)
    y_ref[...] = 1.0 / (1.0 + jnp.exp(-logits))               # sigmoid epilogue


def _pick_tm(batch):
    """Batch tile: prefer >= 2 tiles (dual-TC on v7x), multiple of 8 sublanes."""
    for cand in (256, 128, 64, 32, 16, 8):
        if cand <= batch // 2 and batch % cand == 0:
            return cand
    return batch


def _fused_forward(x, latent_eps,
                   ew0, eb0, ew1, eb1, ew2, eb2,
                   hw0, hb0, hw1, hb1,
                   sw0, sb0, sw1, sb1):
    batch, input_dim = x.shape
    latent_dim = hw0.shape[0]
    output_dim = sw1.shape[1]
    assert ew2.shape[1] == 2 * latent_dim

    tm = _pick_tm(batch)
    grid = (batch // tm,)

    def row_spec(n):
        return pl.BlockSpec((tm, n), lambda i: (i, 0))

    def full_spec(arr):
        return pl.BlockSpec(arr.shape, lambda i: (0, 0))

    in_specs = [
        row_spec(input_dim),                  # x (bf16)
        row_spec(latent_dim),                 # latent eps (f32)
        full_spec(ew0), full_spec(eb0),
        full_spec(ew1), full_spec(eb1),
        full_spec(ew2), full_spec(eb2),
        full_spec(hw0), full_spec(hb0),
        full_spec(hw1), full_spec(hb1),
        full_spec(sw0), full_spec(sb0),
        full_spec(sw1), full_spec(sb1),
    ]
    out_specs = [row_spec(output_dim), row_spec(latent_dim), row_spec(latent_dim)]
    out_shape = (jax.ShapeDtypeStruct((batch, output_dim), jnp.float32),
                 jax.ShapeDtypeStruct((batch, latent_dim), jnp.float32),
                 jax.ShapeDtypeStruct((batch, latent_dim), jnp.float32))

    return pl.pallas_call(
        _fused_forward_kernel,
        out_shape=out_shape,
        grid_spec=pltpu.PrefetchScalarGridSpec(
            num_scalar_prefetch=0,
            grid=grid,
            in_specs=in_specs,
            out_specs=out_specs,
        ),
        compiler_params=pltpu.CompilerParams(
            dimension_semantics=("parallel",),          # batch tiles -> both v7x TCs
            vmem_limit_bytes=32 * 1024 * 1024,          # safe on v5e/v6e/v7x; usage ~3 MiB
        ),
    )(x, latent_eps, ew0, eb0, ew1, eb1, ew2, eb2,
      hw0, hb0, hw1, hb1, sw0, sb0, sw1, sb1)


# ----------------------------------------------------------------------------------
# GenerativeModel parameters, one-time prep, noise sampling, forward.
# ----------------------------------------------------------------------------------
def init_generative_model_params(key, input_dim, output_dim, hidden_dim, latent_dim):
    """Mirrors GenerativeModel.__init__ + add_encoder() + add_head() PyTorch inits."""
    def linear(k, fan_in, fan_out):
        kw, kb = jax.random.split(k)
        bound = 1.0 / math.sqrt(fan_in)
        return {"W": jax.random.uniform(kw, (fan_in, fan_out), jnp.float32, -bound, bound),
                "b": jax.random.uniform(kb, (fan_out,), jnp.float32, -bound, bound)}

    def bayesian(k, fan_in, fan_out):
        kw, kb = jax.random.split(k)
        bound = math.sqrt(1.0 / fan_in)
        return {"W_mu": jax.random.uniform(kw, (fan_in, fan_out), jnp.float32, -bound, bound),
                "b_mu": jax.random.uniform(kb, (fan_out,), jnp.float32, -bound, bound),
                "W_sigma": jnp.full((fan_in, fan_out), -6.0, jnp.float32),
                "b_sigma": jnp.full((fan_out,), -6.0, jnp.float32)}

    ks = jax.random.split(key, 7)
    return {
        "encoder": [linear(ks[0], input_dim, hidden_dim),
                    linear(ks[1], hidden_dim, hidden_dim),
                    linear(ks[2], hidden_dim, 2 * latent_dim)],
        "head": [linear(ks[3], latent_dim, hidden_dim),
                 linear(ks[4], hidden_dim, hidden_dim)],
        "shared": [bayesian(ks[5], hidden_dim, hidden_dim),
                   bayesian(ks[6], hidden_dim, output_dim)],
    }


def prepare_params(params):
    """One-time prep: bf16 weight streams, (1,N) f32 bias rows, hoisted exp(0.5*sigma)."""
    def lin(p):
        return {"W": p["W"].astype(jnp.bfloat16),
                "b": p["b"].reshape(1, -1).astype(jnp.float32)}

    def bayes(p):
        return {"W_mu": p["W_mu"].astype(jnp.float32),
                "W_std": jnp.exp(0.5 * p["W_sigma"]).astype(jnp.float32),
                "b_mu": p["b_mu"].reshape(1, -1).astype(jnp.float32),
                "b_std": jnp.exp(0.5 * p["b_sigma"]).reshape(1, -1).astype(jnp.float32)}

    return {"encoder": [lin(p) for p in params["encoder"]],
            "head": [lin(p) for p in params["head"]],
            "shared": [bayes(p) for p in params["shared"]]}


def _sample_noise(key, batch, latent_dim, w0_shape, w1_shape):
    """Same draws for the Pallas forward and the pure-JAX reference."""
    k_lat, k_w0, k_b0, k_w1, k_b1 = jax.random.split(key, 5)
    return {
        "latent": jax.random.normal(k_lat, (batch, latent_dim), jnp.float32),
        "W0": jax.random.normal(k_w0, w0_shape, jnp.float32),
        "b0": jax.random.normal(k_b0, (w0_shape[1],), jnp.float32),
        "W1": jax.random.normal(k_w1, w1_shape, jnp.float32),
        "b1": jax.random.normal(k_b1, (w1_shape[1],), jnp.float32),
    }


def generative_model_forward(fast_params, x, key):
    """Pallas-backed GenerativeModel.forward; returns (sigmoid(y), mean, log_var)."""
    batch = x.shape[0]
    x2 = x.reshape(batch, -1)
    enc, head, shared = fast_params["encoder"], fast_params["head"], fast_params["shared"]
    latent_dim = head[0]["W"].shape[0]

    noise = _sample_noise(key, batch, latent_dim,
                          shared[0]["W_mu"].shape, shared[1]["W_mu"].shape)

    # Bayesian reparameterization: one weight/bias draw per forward (as in PyTorch),
    # materialized once in f32 and streamed to the kernel as a bf16 weight.
    sw0 = (shared[0]["W_mu"] + shared[0]["W_std"] * noise["W0"]).astype(jnp.bfloat16)
    sb0 = shared[0]["b_mu"] + shared[0]["b_std"] * noise["b0"].reshape(1, -1)
    sw1 = (shared[1]["W_mu"] + shared[1]["W_std"] * noise["W1"]).astype(jnp.bfloat16)
    sb1 = shared[1]["b_mu"] + shared[1]["b_std"] * noise["b1"].reshape(1, -1)

    return _fused_forward(
        x2.astype(jnp.bfloat16), noise["latent"],
        enc[0]["W"], enc[0]["b"], enc[1]["W"], enc[1]["b"], enc[2]["W"], enc[2]["b"],
        head[0]["W"], head[0]["b"], head[1]["W"], head[1]["b"],
        sw0, sb0, sw1, sb1)


# ----------------------------------------------------------------------------------
# Pure-JAX reference (same noise draws, same bf16 matmul precision).
# ----------------------------------------------------------------------------------
def _ref_linear(a, w, b, activation):
    z = jnp.dot(a.astype(jnp.bfloat16), w.astype(jnp.bfloat16),
                preferred_element_type=jnp.float32) + b
    if activation == "relu":
        z = jnp.maximum(z, 0.0)
    elif activation == "sigmoid":
        z = 1.0 / (1.0 + jnp.exp(-z))
    return z


def generative_model_forward_ref(params, x, key):
    batch = x.shape[0]
    x2 = x.reshape(batch, -1)
    enc, head, shared = params["encoder"], params["head"], params["shared"]
    latent_dim = head[0]["W"].shape[0]
    noise = _sample_noise(key, batch, latent_dim,
                          shared[0]["W_mu"].shape, shared[1]["W_mu"].shape)

    h = _ref_linear(x2, enc[0]["W"], enc[0]["b"], "relu")
    h = _ref_linear(h, enc[1]["W"], enc[1]["b"], "relu")
    stats = _ref_linear(h, enc[2]["W"], enc[2]["b"], "none")
    mean, log_var = stats[:, :latent_dim], stats[:, latent_dim:]
    z = mean + jnp.exp(0.5 * log_var) * noise["latent"]

    h = _ref_linear(z, head[0]["W"], head[0]["b"], "relu")
    h = _ref_linear(h, head[1]["W"], head[1]["b"], "relu")

    sw0 = (shared[0]["W_mu"] + jnp.exp(0.5 * shared[0]["W_sigma"]) * noise["W0"]).astype(jnp.bfloat16)
    sb0 = shared[0]["b_mu"] + jnp.exp(0.5 * shared[0]["b_sigma"]) * noise["b0"]
    sw1 = (shared[1]["W_mu"] + jnp.exp(0.5 * shared[1]["W_sigma"]) * noise["W1"]).astype(jnp.bfloat16)
    sb1 = shared[1]["b_mu"] + jnp.exp(0.5 * shared[1]["b_sigma"]) * noise["b1"]

    h = _ref_linear(h, sw0, sb0, "relu")
    y = _ref_linear(h, sw1, sb1, "sigmoid")
    return y, mean, log_var


if __name__ == "__main__":
    # Lane-dense demo shapes: feature dims are multiples of 128, batch fills the MXU.
    BATCH, INPUT_DIM, OUTPUT_DIM, HIDDEN_DIM, LATENT_DIM = 128, 256, 256, 256, 128

    root = jax.random.PRNGKey(0)
    k_params, k_x, k_noise, k_noise2 = jax.random.split(root, 4)

    params = init_generative_model_params(k_params, INPUT_DIM, OUTPUT_DIM,
                                          HIDDEN_DIM, LATENT_DIM)
    fast_params = prepare_params(params)
    x = jax.random.normal(k_x, (BATCH, INPUT_DIM), jnp.float32)

    fwd = jax.jit(generative_model_forward)

    # Run the fused Pallas forward.
    y, mean, log_var = fwd(fast_params, x, k_noise)
    jax.block_until_ready(y)

    # Shape / range sanity.
    assert y.shape == (BATCH, OUTPUT_DIM)
    assert mean.shape == (BATCH, LATENT_DIM) and log_var.shape == (BATCH, LATENT_DIM)
    assert bool(jnp.all(jnp.isfinite(y)))
    assert bool(jnp.all((y >= 0.0) & (y <= 1.0)))            # sigmoid output range

    # Correctness vs pure-JAX reference using identical noise draws.
    y_ref, mean_ref, logvar_ref = generative_model_forward_ref(params, x, k_noise)
    assert jnp.allclose(y, y_ref, atol=1e-2, rtol=1e-2), "output mismatch vs reference"
    assert jnp.allclose(mean, mean_ref, atol=1e-2, rtol=1e-2), "mean mismatch vs reference"
    assert jnp.allclose(log_var, logvar_ref, atol=1e-2, rtol=1e-2), "log_var mismatch vs reference"

    # The stochastic (weight + latent) noise path is live: another key -> different output.
    y2, _, _ = fwd(fast_params, x, k_noise2)
    jax.block_until_ready(y2)
    assert float(jnp.max(jnp.abs(y2 - y))) > 1e-6

    print("KERNEL_OK")
</pallas_src>

<mosaic_0001>
module attributes {stable_mosaic.version = 11 : i64} {
  func.func @_fused_forward_kernel(%arg0: i32, %arg1: memref<64x256xbf16, #tpu.memory_space<vmem>>, %arg2: memref<64x128xf32, #tpu.memory_space<vmem>>, %arg3: memref<256x256xbf16, #tpu.memory_space<vmem>>, %arg4: memref<1x256xf32, #tpu.memory_space<vmem>>, %arg5: memref<256x256xbf16, #tpu.memory_space<vmem>>, %arg6: memref<1x256xf32, #tpu.memory_space<vmem>>, %arg7: memref<256x256xbf16, #tpu.memory_space<vmem>>, %arg8: memref<1x256xf32, #tpu.memory_space<vmem>>, %arg9: memref<128x256xbf16, #tpu.memory_space<vmem>>, %arg10: memref<1x256xf32, #tpu.memory_space<vmem>>, %arg11: memref<256x256xbf16, #tpu.memory_space<vmem>>, %arg12: memref<1x256xf32, #tpu.memory_space<vmem>>, %arg13: memref<256x256xbf16, #tpu.memory_space<vmem>>, %arg14: memref<1x256xf32, #tpu.memory_space<vmem>>, %arg15: memref<256x256xbf16, #tpu.memory_space<vmem>>, %arg16: memref<1x256xf32, #tpu.memory_space<vmem>>, %arg17: memref<64x256xf32, #tpu.memory_space<vmem>>, %arg18: memref<64x128xf32, #tpu.memory_space<vmem>>, %arg19: memref<64x128xf32, #tpu.memory_space<vmem>>) attributes {dimension_semantics = [#tpu.dimension_semantics<parallel>], iteration_bounds = array<i64: 2>, scalar_prefetch = 0 : i64, scratch_operands = 0 : i64, tpu.core_type = #tpu.core_type<tc>, window_params = [{transform_indices = @transform_0, window_bounds = array<i64: 64, 256>}, {transform_indices = @transform_1, window_bounds = array<i64: 64, 128>}, {pipeline_mode = #tpu.pipeline_mode<synchronous>, transform_indices = @transform_2, window_bounds = array<i64: 256, 256>}, {pipeline_mode = #tpu.pipeline_mode<synchronous>, transform_indices = @transform_3, window_bounds = array<i64: 1, 256>}, {pipeline_mode = #tpu.pipeline_mode<synchronous>, transform_indices = @transform_4, window_bounds = array<i64: 256, 256>}, {pipeline_mode = #tpu.pipeline_mode<synchronous>, transform_indices = @transform_5, window_bounds = array<i64: 1, 256>}, {pipeline_mode = #tpu.pipeline_mode<synchronous>, transform_indices = @transform_6, window_bounds = array<i64: 256, 256>}, {pipeline_mode = #tpu.pipeline_mode<synchronous>, transform_indices = @transform_7, window_bounds = array<i64: 1, 256>}, {pipeline_mode = #tpu.pipeline_mode<synchronous>, transform_indices = @transform_8, window_bounds = array<i64: 128, 256>}, {pipeline_mode = #tpu.pipeline_mode<synchronous>, transform_indices = @transform_9, window_bounds = array<i64: 1, 256>}, {pipeline_mode = #tpu.pipeline_mode<synchronous>, transform_indices = @transform_10, window_bounds = array<i64: 256, 256>}, {pipeline_mode = #tpu.pipeline_mode<synchronous>, transform_indices = @transform_11, window_bounds = array<i64: 1, 256>}, {pipeline_mode = #tpu.pipeline_mode<synchronous>, transform_indices = @transform_12, window_bounds = array<i64: 256, 256>}, {pipeline_mode = #tpu.pipeline_mode<synchronous>, transform_indices = @transform_13, window_bounds = array<i64: 1, 256>}, {pipeline_mode = #tpu.pipeline_mode<synchronous>, transform_indices = @transform_14, window_bounds = array<i64: 256, 256>}, {pipeline_mode = #tpu.pipeline_mode<synchronous>, transform_indices = @transform_15, window_bounds = array<i64: 1, 256>}, {transform_indices = @transform_16, window_bounds = array<i64: 64, 256>}, {transform_indices = @transform_17, window_bounds = array<i64: 64, 128>}, {transform_indices = @transform_18, window_bounds = array<i64: 64, 128>}]} {
    %c0 = arith.constant 0 : index
    %c0_0 = arith.constant 0 : index
    %0 = vector.load %arg1[%c0, %c0_0] : memref<64x256xbf16, #tpu.memory_space<vmem>>, vector<64x256xbf16>
    %c0_1 = arith.constant 0 : index
    %c0_2 = arith.constant 0 : index
    %1 = vector.load %arg3[%c0_1, %c0_2] : memref<256x256xbf16, #tpu.memory_space<vmem>>, vector<256x256xbf16>
    %cst = arith.constant dense<0.000000e+00> : vector<64x256xf32>
    %2 = tpu.matmul %0, %1, %cst {dimension_numbers = #tpu.dot_dimension_numbers<[1], [0], [0], [1], [0, 0, 1, 1], [], []>} : vector<64x256xbf16>, vector<256x256xbf16>, vector<64x256xf32> -> vector<64x256xf32>
    %c0_3 = arith.constant 0 : index
    %c0_4 = arith.constant 0 : index
    %3 = vector.load %arg4[%c0_3, %c0_4] : memref<1x256xf32, #tpu.memory_space<vmem>>, vector<1x256xf32>
    %4 = vector.broadcast %3 : vector<1x256xf32> to vector<64x256xf32>
    %5 = arith.addf %2, %4 : vector<64x256xf32>
    %cst_5 = arith.constant 0.000000e+00 : f32
    %6 = vector.broadcast %cst_5 : f32 to vector<64x256xf32>
    %7 = arith.maximumf %5, %6 : vector<64x256xf32>
    %8 = arith.truncf %7 : vector<64x256xf32> to vector<64x256xbf16>
    %c0_6 = arith.constant 0 : index
    %c0_7 = arith.constant 0 : index
    %9 = vector.load %arg5[%c0_6, %c0_7] : memref<256x256xbf16, #tpu.memory_space<vmem>>, vector<256x256xbf16>
    %cst_8 = arith.constant dense<0.000000e+00> : vector<64x256xf32>
    %10 = tpu.matmul %8, %9, %cst_8 {dimension_numbers = #tpu.dot_dimension_numbers<[1], [0], [0], [1], [0, 0, 1, 1], [], []>} : vector<64x256xbf16>, vector<256x256xbf16>, vector<64x256xf32> -> vector<64x256xf32>
    %c0_9 = arith.constant 0 : index
    %c0_10 = arith.constant 0 : index
    %11 = vector.load %arg6[%c0_9, %c0_10] : memref<1x256xf32, #tpu.memory_space<vmem>>, vector<1x256xf32>
    %12 = vector.broadcast %11 : vector<1x256xf32> to vector<64x256xf32>
    %13 = arith.addf %10, %12 : vector<64x256xf32>
    %cst_11 = arith.constant 0.000000e+00 : f32
    %14 = vector.broadcast %cst_11 : f32 to vector<64x256xf32>
    %15 = arith.maximumf %13, %14 : vector<64x256xf32>
    %16 = arith.truncf %15 : vector<64x256xf32> to vector<64x256xbf16>
    %c0_12 = arith.constant 0 : index
    %c0_13 = arith.constant 0 : index
    %17 = vector.load %arg7[%c0_12, %c0_13] : memref<256x256xbf16, #tpu.memory_space<vmem>>, vector<256x256xbf16>
    %cst_14 = arith.constant dense<0.000000e+00> : vector<64x256xf32>
    %18 = tpu.matmul %16, %17, %cst_14 {dimension_numbers = #tpu.dot_dimension_numbers<[1], [0], [0], [1], [0, 0, 1, 1], [], []>} : vector<64x256xbf16>, vector<256x256xbf16>, vector<64x256xf32> -> vector<64x256xf32>
    %c0_15 = arith.constant 0 : index
    %c0_16 = arith.constant 0 : index
    %19 = vector.load %arg8[%c0_15, %c0_16] : memref<1x256xf32, #tpu.memory_space<vmem>>, vector<1x256xf32>
    %20 = vector.broadcast %19 : vector<1x256xf32> to vector<64x256xf32>
    %21 = arith.addf %18, %20 : vector<64x256xf32>
    %22 = vector.extract_strided_slice %21 {offsets = [0, 0], sizes = [64, 128], strides = [1, 1]} : vector<64x256xf32> to vector<64x128xf32>
    %23 = vector.extract_strided_slice %21 {offsets = [0, 128], sizes = [64, 128], strides = [1, 1]} : vector<64x256xf32> to vector<64x128xf32>
    %c0_17 = arith.constant 0 : index
    %c0_18 = arith.constant 0 : index
    %24 = vector.load %arg18[%c0_17, %c0_18] : memref<64x128xf32, #tpu.memory_space<vmem>>, vector<64x128xf32>
    tpu.vector_store %arg18[%c0_17, %c0_18], %22 {strides = array<i32>} : memref<64x128xf32, #tpu.memory_space<vmem>>, vector<64x128xf32>,
    %c0_19 = arith.constant 0 : index
    %c0_20 = arith.constant 0 : index
    %25 = vector.load %arg19[%c0_19, %c0_20] : memref<64x128xf32, #tpu.memory_space<vmem>>, vector<64x128xf32>
    tpu.vector_store %arg19[%c0_19, %c0_20], %23 {strides = array<i32>} : memref<64x128xf32, #tpu.memory_space<vmem>>, vector<64x128xf32>,
    %cst_21 = arith.constant 5.000000e-01 : f32
    %26 = vector.broadcast %cst_21 : f32 to vector<64x128xf32>
    %27 = arith.mulf %26, %23 : vector<64x128xf32>
    %28 = math.exp %27 : vector<64x128xf32>
    %c0_22 = arith.constant 0 : index
    %c0_23 = arith.constant 0 : index
    %29 = vector.load %arg2[%c0_22, %c0_23] : memref<64x128xf32, #tpu.memory_space<vmem>>, vector<64x128xf32>
    %30 = arith.mulf %28, %29 : vector<64x128xf32>
    %31 = arith.addf %22, %30 : vector<64x128xf32>
    %32 = arith.truncf %31 : vector<64x128xf32> to vector<64x128xbf16>
    %c0_24 = arith.constant 0 : index
    %c0_25 = arith.constant 0 : index
    %33 = vector.load %arg9[%c0_24, %c0_25] : memref<128x256xbf16, #tpu.memory_space<vmem>>, vector<128x256xbf16>
    %cst_26 = arith.constant dense<0.000000e+00> : vector<64x256xf32>
    %34 = tpu.matmul %32, %33, %cst_26 {dimension_numbers = #tpu.dot_dimension_numbers<[1], [0], [0], [1], [0, 0, 1, 1], [], []>} : vector<64x128xbf16>, vector<128x256xbf16>, vector<64x256xf32> -> vector<64x256xf32>
    %c0_27 = arith.constant 0 : index
    %c0_28 = arith.constant 0 : index
    %35 = vector.load %arg10[%c0_27, %c0_28] : memref<1x256xf32, #tpu.memory_space<vmem>>, vector<1x256xf32>
    %36 = vector.broadcast %35 : vector<1x256xf32> to vector<64x256xf32>
    %37 = arith.addf %34, %36 : vector<64x256xf32>
    %cst_29 = arith.constant 0.000000e+00 : f32
    %38 = vector.broadcast %cst_29 : f32 to vector<64x256xf32>
    %39 = arith.maximumf %37, %38 : vector<64x256xf32>
    %40 = arith.truncf %39 : vector<64x256xf32> to vector<64x256xbf16>
    %c0_30 = arith.constant 0 : index
    %c0_31 = arith.constant 0 : index
    %41 = vector.load %arg11[%c0_30, %c0_31] : memref<256x256xbf16, #tpu.memory_space<vmem>>, vector<256x256xbf16>
    %cst_32 = arith.constant dense<0.000000e+00> : vector<64x256xf32>
    %42 = tpu.matmul %40, %41, %cst_32 {dimension_numbers = #tpu.dot_dimension_numbers<[1], [0], [0], [1], [0, 0, 1, 1], [], []>} : vector<64x256xbf16>, vector<256x256xbf16>, vector<64x256xf32> -> vector<64x256xf32>
    %c0_33 = arith.constant 0 : index
    %c0_34 = arith.constant 0 : index
    %43 = vector.load %arg12[%c0_33, %c0_34] : memref<1x256xf32, #tpu.memory_space<vmem>>, vector<1x256xf32>
    %44 = vector.broadcast %43 : vector<1x256xf32> to vector<64x256xf32>
    %45 = arith.addf %42, %44 : vector<64x256xf32>
    %cst_35 = arith.constant 0.000000e+00 : f32
    %46 = vector.broadcast %cst_35 : f32 to vector<64x256xf32>
    %47 = arith.maximumf %45, %46 : vector<64x256xf32>
    %48 = arith.truncf %47 : vector<64x256xf32> to vector<64x256xbf16>
    %c0_36 = arith.constant 0 : index
    %c0_37 = arith.constant 0 : index
    %49 = vector.load %arg13[%c0_36, %c0_37] : memref<256x256xbf16, #tpu.memory_space<vmem>>, vector<256x256xbf16>
    %cst_38 = arith.constant dense<0.000000e+00> : vector<64x256xf32>
    %50 = tpu.matmul %48, %49, %cst_38 {dimension_numbers = #tpu.dot_dimension_numbers<[1], [0], [0], [1], [0, 0, 1, 1], [], []>} : vector<64x256xbf16>, vector<256x256xbf16>, vector<64x256xf32> -> vector<64x256xf32>
    %c0_39 = arith.constant 0 : index
    %c0_40 = arith.constant 0 : index
    %51 = vector.load %arg14[%c0_39, %c0_40] : memref<1x256xf32, #tpu.memory_space<vmem>>, vector<1x256xf32>
    %52 = vector.broadcast %51 : vector<1x256xf32> to vector<64x256xf32>
    %53 = arith.addf %50, %52 : vector<64x256xf32>
    %cst_41 = arith.constant 0.000000e+00 : f32
    %54 = vector.broadcast %cst_41 : f32 to vector<64x256xf32>
    %55 = arith.maximumf %53, %54 : vector<64x256xf32>
    %56 = arith.truncf %55 : vector<64x256xf32> to vector<64x256xbf16>
    %c0_42 = arith.constant 0 : index
    %c0_43 = arith.constant 0 : index
    %57 = vector.load %arg15[%c0_42, %c0_43] : memref<256x256xbf16, #tpu.memory_space<vmem>>, vector<256x256xbf16>
    %cst_44 = arith.constant dense<0.000000e+00> : vector<64x256xf32>
    %58 = tpu.matmul %56, %57, %cst_44 {dimension_numbers = #tpu.dot_dimension_numbers<[1], [0], [0], [1], [0, 0, 1, 1], [], []>} : vector<64x256xbf16>, vector<256x256xbf16>, vector<64x256xf32> -> vector<64x256xf32>
    %c0_45 = arith.constant 0 : index
    %c0_46 = arith.constant 0 : index
    %59 = vector.load %arg16[%c0_45, %c0_46] : memref<1x256xf32, #tpu.memory_space<vmem>>, vector<1x256xf32>
    %60 = vector.broadcast %59 : vector<1x256xf32> to vector<64x256xf32>
    %61 = arith.addf %58, %60 : vector<64x256xf32>
    %cst_47 = arith.constant 0.000000e+00 : f32
    %62 = vector.broadcast %cst_47 : f32 to vector<64x256xf32>
    %63 = arith.subf %62, %61 : vector<64x256xf32>
    %64 = math.exp %63 : vector<64x256xf32>
    %cst_48 = arith.constant 1.000000e+00 : f32
    %65 = vector.broadcast %cst_48 : f32 to vector<64x256xf32>
    %66 = arith.addf %65, %64 : vector<64x256xf32>
    %cst_49 = arith.constant 1.000000e+00 : f32
    %67 = vector.broadcast %cst_49 : f32 to vector<64x256xf32>
    %68 = arith.divf %67, %66 : vector<64x256xf32>
    %c0_50 = arith.constant 0 : index
    %c0_51 = arith.constant 0 : index
    %69 = vector.load %arg17[%c0_50, %c0_51] : memref<64x256xf32, #tpu.memory_space<vmem>>, vector<64x256xf32>
    tpu.vector_store %arg17[%c0_50, %c0_51], %68 {strides = array<i32>} : memref<64x256xf32, #tpu.memory_space<vmem>>, vector<64x256xf32>,
    return
  }
  func.func @transform_0(%arg0: i32) -> (i32, i32) {
    %c0_i32 = arith.constant 0 : i32
    %c0_i32_0 = arith.constant 0 : i32
    return %arg0, %c0_i32 : i32, i32
  }
  func.func @transform_1(%arg0: i32) -> (i32, i32) {
    %c0_i32 = arith.constant 0 : i32
    %c0_i32_0 = arith.constant 0 : i32
    return %arg0, %c0_i32 : i32, i32
  }
  func.func @transform_2(%arg0: i32) -> (i32, i32) {
    %c0_i32 = arith.constant 0 : i32
    %c0_i32_0 = arith.constant 0 : i32
    %c0_i32_1 = arith.constant 0 : i32
    return %c0_i32, %c0_i32_0 : i32, i32
  }
  func.func @transform_3(%arg0: i32) -> (i32, i32) {
    %c0_i32 = arith.constant 0 : i32
    %c0_i32_0 = arith.constant 0 : i32
    %c0_i32_1 = arith.constant 0 : i32
    return %c0_i32, %c0_i32_0 : i32, i32
  }
  func.func @transform_4(%arg0: i32) -> (i32, i32) {
    %c0_i32 = arith.constant 0 : i32
    %c0_i32_0 = arith.constant 0 : i32
    %c0_i32_1 = arith.constant 0 : i32
    return %c0_i32, %c0_i32_0 : i32, i32
  }
  func.func @transform_5(%arg0: i32) -> (i32, i32) {
    %c0_i32 = arith.constant 0 : i32
    %c0_i32_0 = arith.constant 0 : i32
    %c0_i32_1 = arith.constant 0 : i32
    return %c0_i32, %c0_i32_0 : i32, i32
  }
  func.func @transform_6(%arg0: i32) -> (i32, i32) {
    %c0_i32 = arith.constant 0 : i32
    %c0_i32_0 = arith.constant 0 : i32
    %c0_i32_1 = arith.constant 0 : i32
    return %c0_i32, %c0_i32_0 : i32, i32
  }
  func.func @transform_7(%arg0: i32) -> (i32, i32) {
    %c0_i32 = arith.constant 0 : i32
    %c0_i32_0 = arith.constant 0 : i32
    %c0_i32_1 = arith.constant 0 : i32
    return %c0_i32, %c0_i32_0 : i32, i32
  }
  func.func @transform_8(%arg0: i32) -> (i32, i32) {
    %c0_i32 = arith.constant 0 : i32
    %c0_i32_0 = arith.constant 0 : i32
    %c0_i32_1 = arith.constant 0 : i32
    return %c0_i32, %c0_i32_0 : i32, i32
  }
  func.func @transform_9(%arg0: i32) -> (i32, i32) {
    %c0_i32 = arith.constant 0 : i32
    %c0_i32_0 = arith.constant 0 : i32
    %c0_i32_1 = arith.constant 0 : i32
    return %c0_i32, %c0_i32_0 : i32, i32
  }
  func.func @transform_10(%arg0: i32) -> (i32, i32) {
    %c0_i32 = arith.constant 0 : i32
    %c0_i32_0 = arith.constant 0 : i32
    %c0_i32_1 = arith.constant 0 : i32
    return %c0_i32, %c0_i32_0 : i32, i32
  }
  func.func @transform_11(%arg0: i32) -> (i32, i32) {
    %c0_i32 = arith.constant 0 : i32
    %c0_i32_0 = arith.constant 0 : i32
    %c0_i32_1 = arith.constant 0 : i32
    return %c0_i32, %c0_i32_0 : i32, i32
  }
  func.func @transform_12(%arg0: i32) -> (i32, i32) {
    %c0_i32 = arith.constant 0 : i32
    %c0_i32_0 = arith.constant 0 : i32
    %c0_i32_1 = arith.constant 0 : i32
    return %c0_i32, %c0_i32_0 : i32, i32
  }
  func.func @transform_13(%arg0: i32) -> (i32, i32) {
    %c0_i32 = arith.constant 0 : i32
    %c0_i32_0 = arith.constant 0 : i32
    %c0_i32_1 = arith.constant 0 : i32
    return %c0_i32, %c0_i32_0 : i32, i32
  }
  func.func @transform_14(%arg0: i32) -> (i32, i32) {
    %c0_i32 = arith.constant 0 : i32
    %c0_i32_0 = arith.constant 0 : i32
    %c0_i32_1 = arith.constant 0 : i32
    return %c0_i32, %c0_i32_0 : i32, i32
  }
  func.func @transform_15(%arg0: i32) -> (i32, i32) {
    %c0_i32 = arith.constant 0 : i32
    %c0_i32_0 = arith.constant 0 : i32
    %c0_i32_1 = arith.constant 0 : i32
    return %c0_i32, %c0_i32_0 : i32, i32
  }
  func.func @transform_16(%arg0: i32) -> (i32, i32) {
    %c0_i32 = arith.constant 0 : i32
    %c0_i32_0 = arith.constant 0 : i32
    return %arg0, %c0_i32 : i32, i32
  }
  func.func @transform_17(%arg0: i32) -> (i32, i32) {
    %c0_i32 = arith.constant 0 : i32
    %c0_i32_0 = arith.constant 0 : i32
    return %arg0, %c0_i32 : i32, i32
  }
  func.func @transform_18(%arg0: i32) -> (i32, i32) {
    %c0_i32 = arith.constant 0 : i32
    %c0_i32_0 = arith.constant 0 : i32
    return %arg0, %c0_i32 : i32, i32
  }
}

</mosaic_0001>

<bundles_post_ra>
// kernel: generative_model_forward.1
= control target key start
LH: loop header
LB: loop body
LE: loop exit
PB: predicated region body
PF: predicated region fallthrough
CT: control target
= control target key end

     0   :  { %s4915_s0 = inlined_call_operand.vmem [shape: bf16[128,256], index: 0, kind: input, shape index: {}]   ;;  %s4916_s1 = inlined_call_operand.vmem [shape: f32[128,128], index: 1, kind: input, shape index: {}]   ;;  %s4917_s2 = inlined_call_operand.vmem [shape: bf16[256,256], index: 2, kind: input, shape index: {}]   ;;  %s4918_s3 = inlined_call_operand.vmem [shape: f32[1,256], index: 3, kind: input, shape index: {}]   ;;  %s4919_s4 = inlined_call_operand.vmem [shape: bf16[256,256], index: 4, kind: input, shape index: {}]   ;;  %s4920_s5 = inlined_call_operand.vmem [shape: f32[1,256], index: 5, kind: input, shape index: {}]   ;;  %s4921_s6 = inlined_call_operand.vmem [shape: bf16[256,256], index: 6, kind: input, shape index: {}]   ;;  %s4922_s7 = inlined_call_operand.vmem [shape: f32[1,256], index: 7, kind: input, shape index: {}]   ;;  %s4923_s8 = inlined_call_operand.vmem [shape: bf16[128,256], index: 8, kind: input, shape index: {}]   ;;  %s4924_s9 = inlined_call_operand.vmem [shape: f32[1,256], index: 9, kind: input, shape index: {}]   ;;  %s4925_s10 = inlined_call_operand.vmem [shape: bf16[256,256], index: 10, kind: input, shape index: {}]   ;;  %s4926_s11 = inlined_call_operand.vmem [shape: f32[1,256], index: 11, kind: input, shape index: {}]   ;;  %s4927_s12 = inlined_call_operand.vmem [shape: bf16[256,256], index: 12, kind: input, shape index: {}]   ;;  %s4928_s13 = inlined_call_operand.vmem [shape: f32[1,256], index: 13, kind: input, shape index: {}]   ;;  %s4929_s14 = inlined_call_operand.vmem [shape: bf16[256,256], index: 14, kind: input, shape index: {}]   ;;  %s4930_s15 = inlined_call_operand.vmem [shape: f32[1,256], index: 15, kind: input, shape index: {}]   ;;  %s4931_s16 = inlined_call_operand.hbm [shape: f32[128,256], index: 16, kind: output, shape index: {0}]   ;;  %s4932_s17 = inlined_call_operand.hbm [shape: f32[128,128], index: 17, kind: output, shape index: {1}]   ;;  %s4933_s18 = inlined_call_operand.hbm [shape: f32[128,128], index: 18, kind: output, shape index: {2}]  }
   0x1   :  { %4947 = sst [smem:[#allocation15_spill]] %s4915_s0 }
   0x2   :  { %4948 = sst [smem:[#allocation16_spill]] %s4916_s1 }
   0x3   :  { %4949 = sst [smem:[#allocation17_spill]] %s4917_s2 }
   0x4   :  { %4950 = sst [smem:[#allocation18_spill]] %s4918_s3 }
   0x5   :  { %4951 = sst [smem:[#allocation19_spill]] %s4919_s4 }
   0x6   :  { %4952 = sst [smem:[#allocation20_spill]] %s4920_s5 }
   0x7   :  { %4953 = sst [smem:[#allocation21_spill]] %s4931_s16 }
   0x8   :  { %24 = vsyncpa [#allocation3], 0 }
   0x9   :  { %26 = vsyncpa [#allocation3 + $0x1], 0 }
   0xa   :  { %27 = vsyncpa [#allocation5], 0 }
   0xb   :  { %29 = vsyncpa [#allocation5 + $0x1], 0  ;;  %s3930_s27 = smov 0   ;;  %s3932_s28 = smov 0  }
   0xc   :  { %s3934_s29 = smov 0   ;;  %s3936_s30 = smov 0  }
   0xd LB: > { %4954 = sst [smem:[#allocation9_spill]] %s3813_s27  ;;  %s3951_s0 = sadd.s32 4294967295, %s3825_s30   ;;  %s3825_s30 = sphi %s3936_s30, %s4977_s30   ;;  %s3821_s29 = sphi %s3934_s29, %s4979_s29   ;;  %s3817_s28 = sphi %s3932_s28, %s4981_s28   ;;  %s3813_s27 = sphi %s3930_s27, %s4980_s27  }
   0xe   : > { %4955 = sst [smem:[#allocation10_spill]] %s3821_s29  ;;  %s4935_s19 = sadd.s32 4294967294, %s3825_s30  }
   0xf   : > { %4956 = sst [smem:[#allocation11_spill]] %s3825_s30  ;;  %s3955_s1 = sadd.s32 1, %s3825_s30  }
  0x10   : > { %4957 = sst [smem:[#allocation12_spill]] %s3955_s1  ;;  %s388_s20 = sadd.s32 1, %s3821_s29 }
  0x11   : > { %s385_s21 = ssub.s32 %s3825_s30, %s3955_s1  ;;  %p398_p0 = scmp.ne.s32.totalorder %s3821_s29, %s3817_s28 }
  0x12   : > { %p386_p1 = scmp.eq.s32.totalorder %s385_s21, 0  ;;  %p399_p2 = scmp.eq.s32.totalorder %s3951_s0, 1 }
  0x13   : > { %p404_p3 = scmp.ne.s32.totalorder %s3817_s28, %s3813_s27  ;;  %p405_p4 = scmp.eq.s32.totalorder %s4935_s19, 1 }
  0x14   : > { %s3968_s22 = scalar_select %p386_p1, %s3821_s29, %s388_s20  }
  0x15   : > { %p3970_p5 = por %p399_p2, %p398_p0  ;;  %p3974_p6 = por %p405_p4, %p404_p3 }
  0x16   : > { %4958 = sst [smem:[#allocation13_spill]] %s3968_s22  ;;  %p3009_p7 = scmp.ge.s32.totalorder %s3825_s30, 1 }
  0x17   : > { %s4960_s23 = scalar_select %p3974_p6, 1, 0 }
  0x18   : > { %p536_p8 = scmp.lt.s32.totalorder %s3825_s30, 3 }
  0x19   : > { %4961 = sst [smem:[#allocation14_spill]] %s4960_s23 }
  0x1a   : > { %p537_p9 = pnand %p3009_p7, %p536_p8 }
  0x1b   : > { %s4962_s26 = sld [smem:[#allocation17_spill]] (!%p537_p9)  ;;  %s3013_s24 = sshll.u32 (!%p537_p9), %s3951_s0, 3 }
  0x1c   : > { %540 = sbr.rel (%p537_p9) target bundleno = 1627 (0x65b), region = 84  ;;  %p607_p10 = scmp.lt.s32.totalorder (!%p537_p9), %s3013_s24, 15 }
  0x1d   : > { %s4963_s30 = sld [smem:[#allocation15_spill]] (!%p537_p9)  ;;  %s3828_s27 = smov (!%p537_p9), [#allocation4]  }
  0x1e   : > { %s4964_s4 = sld [smem:[#allocation19_spill]] (!%p537_p9) }
  0x1f   : > { %s4965_s3 = sld [smem:[#allocation18_spill]] (!%p537_p9) }
  0x20   : > { %s4966_s5 = sld [smem:[#allocation20_spill]] (!%p537_p9) }
  0x21   : > { %v3305_v0 = vld [vmem:[%s4962_s26 + $0x74] ss:$8 sps:$4 sm:$0xff]   ;;  %v3307_v1 = vld [vmem:[%s4962_s26 + $0x70] ss:$8 sps:$4 sm:$0xff]   ;;  %v3308_v2 = vld [vmem:[%s4962_s26 + $0x64] ss:$8 sps:$4 sm:$0xff]  }
  0x22   : > { %875 = vmatprep.subr.bf16.mxu0 %v3305_v0  ;;  %v3310_v3 = vld [vmem:[%s4962_s26 + $0x60] ss:$8 sps:$4 sm:$0xff]   ;;  %v3311_v4 = vld [vmem:[%s4962_s26 + $0x54] ss:$8 sps:$4 sm:$0xff]   ;;  %v3313_v5 = vld [vmem:[%s4962_s26 + $0x50] ss:$8 sps:$4 sm:$0xff]  }
  0x23   : > { %876 = vmatpush1.bf16.msra.mxu0 %v3307_v1  ;;  %v3314_v6 = vld [vmem:[%s4962_s26 + $0x44] ss:$8 sps:$4 sm:$0xff]   ;;  %v3316_v7 = vld [vmem:[%s4962_s26 + $0x40] ss:$8 sps:$4 sm:$0xff]   ;;  %v3317_v8 = vld [vmem:[%s4962_s26 + $0x34] ss:$8 sps:$4 sm:$0xff]  }
  0x24   : > { %877 = vmatprep.subr.bf16.mxu0 %v3308_v2  ;;  %s4983_s24 = smov (!%p607_p10, %s3013_s24), 15  ;;  %v3319_v9 = vld [vmem:[%s4962_s26 + $0x30] ss:$8 sps:$4 sm:$0xff]   ;;  %v3320_v10 = vld [vmem:[%s4962_s26 + $0x24] ss:$8 sps:$4 sm:$0xff]   ;;  %s4968_s29 = sld [smem:[#allocation16_spill]] }
  0x25   : > { %s4944_s19 = sshll.u32 %s4983_s24, 3  ;;  %v3322_v11 = vld [vmem:[%s4962_s26 + $0x20] ss:$8 sps:$4 sm:$0xff]   ;;  %v3323_v12 = vld [vmem:[%s4962_s26 + $0x14] ss:$8 sps:$4 sm:$0xff]   ;;  %s4967_s25 = sshll.u32 %s4983_s24, 3 }
  0x26   : > { %s4025_s16 = scalar_lea.vmem %s4963_s30, %s4944_s19  ;;  %v3325_v14 = vld [vmem:[%s4962_s26 + $0x10] ss:$8 sps:$4 sm:$0xff]   ;;  %v3326_v15 = vld [vmem:[%s4962_s26 + $0x4] ss:$8 sps:$4 sm:$0xff]   ;;  %v3328_v16 = vld [vmem:[%s4962_s26] ss:$8 sps:$4 sm:$0xff]  }
  0x27   : > { %878 = vmatpush1.bf16.msra.mxu0 %v3310_v3  ;;  %v3355_v13 = vld [vmem:[%s4025_s16 + $0x4] ss:$8 sps:$4 sm:$0xff]   ;;  %v3329_v17 = vld [vmem:[%s4962_s26 + $0xf4] ss:$8 sps:$4 sm:$0xff]   ;;  %v3367_v19 = vld [vmem:[%s4964_s4 + $0x70] ss:$8 sps:$4 sm:$0xff]  }
  0x28   : > { %879 = vmatprep.subr.bf16.mxu0 %v3311_v4  ;;  %907 = vmatprep.mubr.bf16.mxu0 %v3355_v13  ;;  %v3365_v18 = vld [vmem:[%s4964_s4 + $0x74] ss:$8 sps:$4 sm:$0xff]   ;;  %v3368_v20 = vld [vmem:[%s4964_s4 + $0x64] ss:$8 sps:$4 sm:$0xff]   ;;  %v3370_v21 = vld [vmem:[%s4964_s4 + $0x60] ss:$8 sps:$4 sm:$0xff]  }
  0x29   : > { %1176 = vmatprep.subr.bf16.mxu1 %v3365_v18  ;;  %v3331_v22 = vld [vmem:[%s4962_s26 + $0xf0] ss:$8 sps:$4 sm:$0xff]   ;;  %v3371_v23 = vld [vmem:[%s4964_s4 + $0x54] ss:$8 sps:$4 sm:$0xff]   ;;  %v3332_v24 = vld [vmem:[%s4962_s26 + $0xe4] ss:$8 sps:$4 sm:$0xff]  }
  0x2a   : > { %1177 = vmatpush1.bf16.msra.mxu1 %v3367_v19  ;;  %v3373_v25 = vld [vmem:[%s4964_s4 + $0x50] ss:$8 sps:$4 sm:$0xff]   ;;  %v3334_v26 = vld [vmem:[%s4962_s26 + $0xe0] ss:$8 sps:$4 sm:$0xff]   ;;  %v3374_v27 = vld [vmem:[%s4964_s4 + $0x44] ss:$8 sps:$4 sm:$0xff]   ;;  %s4406_s1 = scalar_lea.vmem %s4968_s29, %s4967_s25 }
  0x2b   : > { %880 = vmatpush1.bf16.msra.mxu0 %v3313_v5  ;;  %1178 = vmatprep.subr.bf16.mxu1 %v3368_v20  ;;  %v3335_v28 = vld [vmem:[%s4962_s26 + $0xd4] ss:$8 sps:$4 sm:$0xff]   ;;  %v3376_v29 = vld [vmem:[%s4964_s4 + $0x40] ss:$8 sps:$4 sm:$0xff]   ;;  %v3337_v30 = vld [vmem:[%s4962_s26 + $0xd0] ss:$8 sps:$4 sm:$0xff]  }
  0x2c   : > { %881 = vmatprep.subr.bf16.mxu0 %v3314_v6  ;;  %v3377_v31 = vld [vmem:[%s4964_s4 + $0x34] ss:$8 sps:$4 sm:$0xff]   ;;  %v3338_v32 = vld [vmem:[%s4962_s26 + $0xc4] ss:$8 sps:$4 sm:$0xff]   ;;  %v3340_v33 = vld [vmem:[%s4962_s26 + $0xc0] ss:$8 sps:$4 sm:$0xff]  }
  0x2d   : > { %v3379_v34 = vld [vmem:[%s4964_s4 + $0x30] ss:$8 sps:$4 sm:$0xff]   ;;  %v3341_v35 = vld [vmem:[%s4962_s26 + $0xb4] ss:$8 sps:$4 sm:$0xff]   ;;  %v3380_v36 = vld [vmem:[%s4964_s4 + $0x24] ss:$8 sps:$4 sm:$0xff]  }
  0x2e   : > { %1179 = vmatpush1.bf16.msra.mxu1 %v3370_v21  ;;  %v3382_v37 = vld [vmem:[%s4964_s4 + $0x20] ss:$8 sps:$4 sm:$0xff]   ;;  %v3343_v38 = vld [vmem:[%s4962_s26 + $0xb0] ss:$8 sps:$4 sm:$0xff]   ;;  %v3383_v39 = vld [vmem:[%s4964_s4 + $0x14] ss:$8 sps:$4 sm:$0xff]  }
  0x2f   : > { %882 = vmatpush1.bf16.msra.mxu0 %v3316_v7  ;;  %1180 = vmatprep.subr.bf16.mxu1 %v3371_v23  ;;  %v3344_v40 = vld [vmem:[%s4962_s26 + $0xa4] ss:$8 sps:$4 sm:$0xff]   ;;  %v3385_v41 = vld [vmem:[%s4964_s4 + $0x10] ss:$8 sps:$4 sm:$0xff]   ;;  %v3346_v42 = vld [vmem:[%s4962_s26 + $0xa0] ss:$8 sps:$4 sm:$0xff]  }
  0x30   : > { %883 = vmatprep.subr.bf16.mxu0 %v3317_v8  ;;  %v3386_v43 = vld [vmem:[%s4964_s4 + $0x4] ss:$8 sps:$4 sm:$0xff]   ;;  %v3347_v44 = vld [vmem:[%s4962_s26 + $0x94] ss:$8 sps:$4 sm:$0xff]   ;;  %v3388_v45 = vld [vmem:[%s4964_s4] ss:$8 sps:$4 sm:$0xff]  }
  0x31   : > { %v3349_v46 = vld [vmem:[%s4962_s26 + $0x90] ss:$8 sps:$4 sm:$0xff]   ;;  %v3389_v47 = vld [vmem:[%s4964_s4 + $0xf4] ss:$8 sps:$4 sm:$0xff]   ;;  %v3350_v48 = vld [vmem:[%s4962_s26 + $0x84] ss:$8 sps:$4 sm:$0xff]  }
  0x32   : > { %1181 = vmatpush1.bf16.msra.mxu1 %v3373_v25  ;;  %v3391_v49 = vld [vmem:[%s4964_s4 + $0xf0] ss:$8 sps:$4 sm:$0xff]   ;;  %v3352_v50 = vld [vmem:[%s4962_s26 + $0x80] ss:$8 sps:$4 sm:$0xff]   ;;  %v3392_v51 = vld [vmem:[%s4964_s4 + $0xe4] ss:$8 sps:$4 sm:$0xff]  }
  0x33   : > { %884 = vmatpush1.bf16.msra.mxu0 %v3319_v9  ;;  %1182 = vmatprep.subr.bf16.mxu1 %v3374_v27  ;;  %v3353_v52 = vld [vmem:[%s4025_s16] ss:$8 sps:$4 sm:$0xff]   ;;  %v3356_v54 = vld [vmem:[%s4025_s16 + $0x14] ss:$8 sps:$4 sm:$0xff]   ;;  %v3397_v56 = vld [vmem:[%s4964_s4 + $0xd0] ss:$8 sps:$4 sm:$0xff]  }
  0x34   : > { %885 = vmatprep.subr.bf16.mxu0 %v3320_v10  ;;  %v3394_v53 = vld [vmem:[%s4964_s4 + $0xe0] ss:$8 sps:$4 sm:$0xff]   ;;  %v3395_v55 = vld [vmem:[%s4964_s4 + $0xd4] ss:$8 sps:$4 sm:$0xff]   ;;  %v3398_v57 = vld [vmem:[%s4964_s4 + $0xc4] ss:$8 sps:$4 sm:$0xff]  }
  0x35   : > { %v3358_v58 = vld [vmem:[%s4025_s16 + $0x10] ss:$8 sps:$4 sm:$0xff]   ;;  %v3400_v59 = vld [vmem:[%s4964_s4 + $0xc0] ss:$8 sps:$4 sm:$0xff]   ;;  %v3359_v60 = vld [vmem:[%s4025_s16 + $0x24] ss:$8 sps:$4 sm:$0xff]  }
  0x36   : > { %1183 = vmatpush1.bf16.msra.mxu1 %v3376_v29  ;;  %v3401_v61 = vld [vmem:[%s4964_s4 + $0xb4] ss:$8 sps:$4 sm:$0xff]   ;;  %v3403_v62 = vld [vmem:[%s4964_s4 + $0xb0] ss:$8 sps:$4 sm:$0xff]   ;;  %v3361_v63 = vld [vmem:[%s4025_s16 + $0x20] ss:$8 sps:$4 sm:$0xff]  }
  0x37   : > { %886 = vmatpush1.bf16.msra.mxu0 %v3322_v11  ;;  %1184 = vmatprep.subr.bf16.mxu1 %v3377_v31  ;;  %v3362_v0 = vld [vmem:[%s4025_s16 + $0x34] ss:$8 sps:$4 sm:$0xff]   ;;  %v3364_v1 = vld [vmem:[%s4025_s16 + $0x30] ss:$8 sps:$4 sm:$0xff]   ;;  %v3404_v2 = vld [vmem:[%s4964_s4 + $0xa4] ss:$8 sps:$4 sm:$0xff]  }
  0x38   : > { %887 = vmatprep.subr.bf16.mxu0 %v3323_v12  ;;  %v3406_v3 = vld [vmem:[%s4964_s4 + $0xa0] ss:$8 sps:$4 sm:$0xff]   ;;  %v3407_v4 = vld [vmem:[%s4964_s4 + $0x94] ss:$8 sps:$4 sm:$0xff]   ;;  %v3409_v5 = vld [vmem:[%s4964_s4 + $0x90] ss:$8 sps:$4 sm:$0xff]  }
  0x39   : > { %v3410_v6 = vld [vmem:[%s4964_s4 + $0x84] ss:$8 sps:$4 sm:$0xff]   ;;  %v3412_v7 = vld [vmem:[%s4964_s4 + $0x80] ss:$8 sps:$4 sm:$0xff]   ;;  %v3413_v8 = vld [vmem:[%s4921_s6 + $0x70] ss:$8 sps:$4 sm:$0xff]  }
  0x3a   : > { %1185 = vmatpush1.bf16.msra.mxu1 %v3379_v34  ;;  %v3415_v9 = vld [vmem:[%s4921_s6 + $0x74] ss:$8 sps:$4 sm:$0xff]   ;;  %v3418_v10 = vld [vmem:[%s4921_s6 + $0x64] ss:$8 sps:$4 sm:$0xff]   ;;  %v3416_v11 = vld [vmem:[%s4921_s6 + $0x60] ss:$8 sps:$4 sm:$0xff]   ;;  %v665_v34 = vlaneseq }
  0x3b   : > { %888 = vmatpush1.bf16.msra.mxu0 %v3325_v14  ;;  %1186 = vmatprep.subr.bf16.mxu1 %v3380_v36  ;;  %v3421_v12 = vld [vmem:[%s4921_s6 + $0x54] ss:$8 sps:$4 sm:$0xff]   ;;  %v3419_v13 = vld [vmem:[%s4921_s6 + $0x50] ss:$8 sps:$4 sm:$0xff]   ;;  %v3424_v14 = vld [vmem:[%s4921_s6 + $0x44] ss:$8 sps:$4 sm:$0xff]  }
  0x3c   : > { %889 = vmatprep.subr.bf16.mxu0 %v3326_v15  ;;  %v3422_v15 = vld [vmem:[%s4921_s6 + $0x40] ss:$8 sps:$4 sm:$0xff]   ;;  %v3430_v18 = vld [vmem:[%s4921_s6 + $0x24] ss:$8 sps:$4 sm:$0xff]   ;;  %v3433_v20 = vld [vmem:[%s4921_s6 + $0x14] ss:$8 sps:$4 sm:$0xff]  }
  0x3d   : > { %v3428_v19 = vld [vmem:[%s4921_s6 + $0x20] ss:$8 sps:$4 sm:$0xff]   ;;  %v3431_v21 = vld [vmem:[%s4921_s6 + $0x10] ss:$8 sps:$4 sm:$0xff]   ;;  %s4354_s30 = sand.u32 1, %s3817_s28   ;;  %s2819_s19 = sand.u32 1, %s3951_s0  }
  0x3e   : > { %1187 = vmatpush1.bf16.msra.mxu1 %v3382_v37  ;;  %v3434_v23 = vld [vmem:[%s4921_s6] ss:$8 sps:$4 sm:$0xff]   ;;  %v3437_v25 = vld [vmem:[%s4921_s6 + $0xf0] ss:$8 sps:$4 sm:$0xff]   ;;  %s3011_s22 = sshll.u32 %s4354_s30, 6 }
  0x3f   : > { %890 = vmatpush1.bf16.msra.mxu0 %v3328_v16  ;;  %1188 = vmatprep.subr.bf16.mxu1 %v3383_v39  ;;  %v3427_v16 = vld [vmem:[%s4921_s6 + $0x34] ss:$8 sps:$4 sm:$0xff]   ;;  %v3440_v27 = vld [vmem:[%s4921_s6 + $0xe0] ss:$8 sps:$4 sm:$0xff]   ;;  %v3443_v29 = vld [vmem:[%s4921_s6 + $0xd0] ss:$8 sps:$4 sm:$0xff]  }
  0x40   : > { %891 = vmatprep.subr.bf16.mxu0 %v3329_v17  ;;  %v3425_v17 = vld [vmem:[%s4921_s6 + $0x30] ss:$8 sps:$4 sm:$0xff]   ;;  %v3446_v31 = vld [vmem:[%s4921_s6 + $0xc0] ss:$8 sps:$4 sm:$0xff]   ;;  %s4369_s16 = scalar_lea.vmem [#allocation4], %s3011_s22  ;;  %s4374_s23 = scalar_lea.vmem [#allocation6], %s3011_s22 }
  0x41   : > { %s4945_s22 = sshll.u32 %s3951_s0, 10  ;;  %s2855_s29 = sshll.u32 %s4369_s16, 4  ;;  %s4763_s29 = int_to_ptr.vmem [resolvable:$true] %s2855_s29 }
  0x42   : > { %1189 = vmatpush1.bf16.msra.mxu1 %v3385_v41  ;;  %s4760_s20 = scalar_lea.hbm %s4932_s17, %s4945_s22  ;;  %s3709_s24 = scalar_lea.vmem %s4763_s29, 1024 }
  0x43   : > { %892 = vmatpush2.bf16.msra.mxu0 %v3331_v22  ;;  %1190 = vmatprep.subr.bf16.mxu1 %v3386_v43  ;;  %v3436_v22 = vld [vmem:[%s4921_s6 + $0x4] ss:$8 sps:$4 sm:$0xff]   ;;  %p3710_p11 = scmp.ne.s32.totalorder %s4763_s29, %s3709_s24 }
  0x44   : > { %893 = vmatprep.subr.bf16.mxu0 %v3332_v24  ;;  %v3439_v24 = vld [vmem:[%s4921_s6 + $0xf4] ss:$8 sps:$4 sm:$0xff]  }
  0x45   : > { %p3711_p12 = pnand %p3710_p11, %p3970_p5 }
  0x46   : > { %1191 = vmatpush1.bf16.msra.mxu1 %v3388_v45 }
  0x47   : > { %894 = vmatpush2.bf16.msra.mxu0 %v3334_v26  ;;  %1192 = vmatprep.subr.bf16.mxu1 %v3389_v47  ;;  %v3442_v26 = vld [vmem:[%s4921_s6 + $0xe4] ss:$8 sps:$4 sm:$0xff]   ;;  %p3712_p13 = pneg %p3711_p12 }
  0x48   : > { %895 = vmatprep.subr.bf16.mxu0 %v3335_v28  ;;  %v3445_v28 = vld [vmem:[%s4921_s6 + $0xd4] ss:$8 sps:$4 sm:$0xff]  }
  0x4a   : > { %1193 = vmatpush2.bf16.msra.mxu1 %v3391_v49 }
  0x4b   : > { %896 = vmatpush2.bf16.msra.mxu0 %v3337_v30  ;;  %1194 = vmatprep.subr.bf16.mxu1 %v3392_v51  ;;  %v3448_v30 = vld [vmem:[%s4921_s6 + $0xc4] ss:$8 sps:$4 sm:$0xff]  }
  0x4c   : > { %897 = vmatprep.subr.bf16.mxu0 %v3338_v32  ;;  %v3451_v32 = vld [vmem:[%s4921_s6 + $0xb4] ss:$8 sps:$4 sm:$0xff]  }
  0x4e   : > { %1195 = vmatpush2.bf16.msra.mxu1 %v3394_v53 }
  0x4f   : > { %898 = vmatpush2.bf16.msra.mxu0 %v3340_v33  ;;  %1196 = vmatprep.subr.bf16.mxu1 %v3395_v55  ;;  %v3449_v33 = vld [vmem:[%s4921_s6 + $0xb0] ss:$8 sps:$4 sm:$0xff]  }
  0x50   : > { %899 = vmatprep.subr.bf16.mxu0 %v3341_v35  ;;  %v666_v35 = vshrl.u32 %v665_v34, 7  ;;  %v3452_v34 = vld [vmem:[%s4921_s6 + $0xa0] ss:$8 sps:$4 sm:$0xff]  }
  0x52   : > { %1197 = vmatpush2.bf16.msra.mxu1 %v3397_v56  ;;  %v4269_v36 = vsub.s32 1, %v666_v35  ;;  %v4271_v37 = vsub.s32 0, %v666_v35  ;;  %v3457_v35 = vld [vmem:[%s4921_s6 + $0x94] ss:$8 sps:$4 sm:$0xff]  }
  0x53   : > { %900 = vmatpush2.bf16.msra.mxu0 %v3343_v38  ;;  %1198 = vmatprep.subr.bf16.mxu1 %v3398_v57  ;;  %v663_v38 = vld [vmem:[%s4965_s3] sm:$0x3]  ;;  %s3713_s3 = sshll.u32 %s3828_s27, 4  ;;  %s3714_s3 = int_to_ptr.vmem [resolvable:$false] %s3713_s3 }
  0x54   : > { %901 = vmatprep.subr.bf16.mxu0 %v3344_v40  ;;  %v672_v40 = vrot.slane %v663_v38, %v4269_v36  ;;  %v668_v41 = vrot.slane %v663_v38, %v4271_v37  ;;  %v3455_v38 = vld [vmem:[%s4921_s6 + $0x90] ss:$8 sps:$4 sm:$0xff]   ;;  %s3715_s4 = scalar_lea.vmem %s3714_s3, 2048  ;;  %p3716_p0 = scmp.lt.s32.totalorder %s4763_s29, %s3714_s3 }
  0x55   : > { %p3717_p1 = scmp.lt.s32.totalorder %s3715_s4, %s3709_s24 }
  0x56   : > { %1199 = vmatpush2.bf16.msra.mxu1 %v3400_v59 }
  0x57   : > { %902 = vmatpush2.bf16.msra.mxu0 %v3346_v42  ;;  %1200 = vmatprep.subr.bf16.mxu1 %v3401_v61  ;;  %p3718_p2 = por %p3717_p1, %p3716_p0 }
  0x58   : > { %903 = vmatprep.subr.bf16.mxu0 %v3347_v44 }
  0x59   : > { %p3719_p3 = pnand %p3718_p2, %p3712_p13 }
  0x5a   : > { %1201 = vmatpush2.bf16.msra.mxu1 %v3403_v62 }
  0x5b   : > { %904 = vmatpush2.bf16.msra.mxu0 %v3349_v46  ;;  %1202 = vmatprep.subr.bf16.mxu1 %v3404_v2 }
  0x5c   : > { %905 = vmatprep.subr.bf16.mxu0 %v3350_v48 }
  0x5e   : > { %1203 = vmatpush2.bf16.msra.mxu1 %v3406_v3 }
  0x5f   : > { %906 = vmatpush2.bf16.msra.mxu0 %v3352_v50  ;;  %1204 = vmatprep.subr.bf16.mxu1 %v3407_v4 }
  0x60   : > { %1477 = vmatprep.subr.bf16.mxu0 %v3415_v9 }
  0x62   : > { %908 = vmatmul.mubr.bf16.vlgmr.msra.gmra.mxu0 %v3353_v52  ;;  %1205 = vmatpush2.bf16.msra.mxu1 %v3409_v5 }
  0x63   : > { %917 = vmatprep.mubr.bf16.mxu0 %v3356_v54  ;;  %1206 = vmatprep.subr.bf16.mxu1 %v3410_v6 }
  0x64   : > { %1478 = vmatpush1.bf16.msra.mxu0 %v3413_v8 }
  0x65   : > { %1479 = vmatprep.subr.bf16.mxu0 %v3418_v10 }
  0x66   : > { %1207 = vmatpush2.bf16.msra.mxu1 %v3412_v7 }
  0x68   : > { %1480 = vmatpush1.bf16.msra.mxu0 %v3416_v11 }
  0x69   : > { %1481 = vmatprep.subr.bf16.mxu0 %v3421_v12 }
  0x6a   : > { %918 = vmatmul.mubr.bf16.gmra.mxu0 %v3358_v58 }
  0x6b   : > { %927 = vmatprep.mubr.bf16.mxu0 %v3359_v60 }
  0x6c   : > { %1482 = vmatpush1.bf16.msra.mxu0 %v3419_v13 }
  0x6d   : > { %1483 = vmatprep.subr.bf16.mxu0 %v3424_v14 }
  0x70   : > { %1484 = vmatpush1.bf16.msra.mxu0 %v3422_v15 }
  0x71   : > { %1485 = vmatprep.subr.bf16.mxu0 %v3427_v16 }
  0x72   : > { %928 = vmatmul.mubr.bf16.gmra.mxu0 %v3361_v63 }
  0x73   : > { %937 = vmatprep.mubr.bf16.mxu0 %v3362_v0 }
  0x74   : > { %1486 = vmatpush1.bf16.msra.mxu0 %v3425_v17 }
  0x75   : > { %1487 = vmatprep.subr.bf16.mxu0 %v3430_v18 }
  0x78   : > { %1488 = vmatpush1.bf16.msra.mxu0 %v3428_v19 }
  0x79   : > { %1489 = vmatprep.subr.bf16.mxu0 %v3433_v20 }
  0x7a   : > { %938 = vmatmul.mubr.bf16.gmra.mxu0 %v3364_v1 }
  0x7c   : > { %1490 = vmatpush1.bf16.msra.mxu0 %v3431_v21 }
  0x7d   : > { %1491 = vmatprep.subr.bf16.mxu0 %v3436_v22 }
  0x80   : > { %1492 = vmatpush1.bf16.msra.mxu0 %v3434_v23 }
  0x81   : > { %1493 = vmatprep.subr.bf16.mxu0 %v3439_v24 }
  0x84   : > { %1494 = vmatpush2.bf16.msra.mxu0 %v3437_v25 }
  0x85   : > { %1495 = vmatprep.subr.bf16.mxu0 %v3442_v26 }
  0x88   : > { %1496 = vmatpush2.bf16.msra.mxu0 %v3440_v27 }
  0x89   : > { %1497 = vmatprep.subr.bf16.mxu0 %v3445_v28 }
  0x8c   : > { %1498 = vmatpush2.bf16.msra.mxu0 %v3443_v29 }
  0x8d   : > { %1499 = vmatprep.subr.bf16.mxu0 %v3448_v30 }
  0x90   : > { %1500 = vmatpush2.bf16.msra.mxu0 %v3446_v31 }
  0x91   : > { %1501 = vmatprep.subr.bf16.mxu0 %v3451_v32 }
  0x94   : > { %1502 = vmatpush2.bf16.msra.mxu0 %v3449_v33  ;;  %v3454_v33 = vld [vmem:[%s4921_s6 + $0xa4] ss:$8 sps:$4 sm:$0xff]  }
  0x95   : > { %1503 = vmatprep.subr.bf16.mxu0 %v3454_v33 }
  0x98   : > { %1504 = vmatpush2.bf16.msra.mxu0 %v3452_v34 }
  0x99   : > { %1505 = vmatprep.subr.bf16.mxu0 %v3457_v35 }
  0x9c   : > { %1506 = vmatpush2.bf16.msra.mxu0 %v3455_v38  ;;  %v3463_v38 = vld [vmem:[%s4923_s8 + $0x74] ss:$8 sps:$4 sm:$0xff]  }
  0x9d   : > { %1726 = vmatprep.subr.bf16.mxu1 %v3463_v38 }
 0x122   : > { %v909_v39 = vpop.f32.mrf.mxu0 }
 0x123   : > { %v910_v46 = vadd.f32 %v909_v39, %v668_v41  ;;  %v3460_v39 = vld [vmem:[%s4921_s6 + $0x84] ss:$8 sps:$4 sm:$0xff]  }
 0x124   : > { %v911_v42 = vpop.f32.mrf.mxu0  ;;  %1507 = vmatprep.subr.bf16.mxu0 %v3460_v39  ;;  %v3461_v39 = vld [vmem:[%s4923_s8 + $0x70] ss:$8 sps:$4 sm:$0xff]  }
 0x125   : > { %v912_v44 = vadd.f32 %v911_v42, %v672_v40  ;;  %v948_v53 = vmax.f32 %v910_v46, 0.0 }
 0x126   : > { %v913_v43 = vpop.f32.mrf.mxu0 }
 0x127   : > { %v914_v45 = vadd.f32 %v913_v43, %v668_v41  ;;  %v949_v51 = vmax.f32 %v912_v44, 0.0 }
 0x128   : > { %v915_v47 = vpop.f32.mrf.mxu0 }
 0x129   : > { %v916_v48 = vadd.f32 %v915_v47, %v672_v40  ;;  %v950_v49 = vmax.f32 %v914_v45, 0.0 }
 0x12a   : > { %v919_v50 = vpop.f32.mrf.mxu0 }
 0x12b   : > { %v951_v52 = vmax.f32 %v916_v48, 0.0  ;;  %v964_v56 = vpack.c.bf16 %v950_v49, %v948_v53  ;;  %v920_v60 = vadd.f32 %v919_v50, %v668_v41 }
 0x12c   : > { %v921_v54 = vpop.f32.mrf.mxu0 }
 0x12d   : > { %v965_v55 = vpack.c.bf16 %v951_v52, %v949_v51  ;;  %v922_v58 = vadd.f32 %v921_v54, %v672_v40  ;;  %v952_v3 = vmax.f32 %v920_v60, 0.0 }
 0x12e   : > { %v923_v57 = vpop.f32.mrf.mxu0 }
 0x12f   : > { %v924_v59 = vadd.f32 %v923_v57, %v668_v41  ;;  %1208 = vmatprep.mubr.bf16.mxu1 %v965_v55  ;;  %v953_v1 = vmax.f32 %v922_v58, 0.0 }
 0x130   : > { %v925_v61 = vpop.f32.mrf.mxu0  ;;  %1209 = vmatmul.mubr.bf16.vlgmr.msra.gmra.mxu1 %v964_v56 }
 0x131   : > { %v926_v62 = vadd.f32 %v925_v61, %v672_v40  ;;  %v954_v63 = vmax.f32 %v924_v59, 0.0  ;;  %1727 = vmatpush1.bf16.msra.mxu1 %v3461_v39 }
 0x132   : > { %v929_v0 = vpop.f32.mrf.mxu0 }
 0x133   : > { %v955_v2 = vmax.f32 %v926_v62, 0.0  ;;  %v966_v6 = vpack.c.bf16 %v954_v63, %v952_v3  ;;  %v930_v10 = vadd.f32 %v929_v0, %v668_v41 }
 0x134   : > { %v931_v4 = vpop.f32.mrf.mxu0 }
 0x135   : > { %v967_v5 = vpack.c.bf16 %v955_v2, %v953_v1  ;;  %v932_v8 = vadd.f32 %v931_v4, %v672_v40  ;;  %v956_v17 = vmax.f32 %v930_v10, 0.0 }
 0x136   : > { %v933_v7 = vpop.f32.mrf.mxu0 }
 0x137   : > { %v934_v9 = vadd.f32 %v933_v7, %v668_v41  ;;  %1218 = vmatprep.mubr.bf16.mxu1 %v967_v5  ;;  %v957_v15 = vmax.f32 %v932_v8, 0.0 }
 0x138   : > { %v935_v11 = vpop.f32.mrf.mxu0  ;;  %1219 = vmatmul.mubr.bf16.gmra.mxu1 %v966_v6 }
 0x139   : > { %v936_v12 = vadd.f32 %v935_v11, %v672_v40  ;;  %v958_v13 = vmax.f32 %v934_v9, 0.0 }
 0x13a   : > { %v939_v14 = vpop.f32.mrf.mxu0 }
 0x13b   : > { %v959_v16 = vmax.f32 %v936_v12, 0.0  ;;  %v968_v20 = vpack.c.bf16 %v958_v13, %v956_v17  ;;  %v940_v24 = vadd.f32 %v939_v14, %v668_v41 }
 0x13c   : > { %v941_v18 = vpop.f32.mrf.mxu0 }
 0x13d   : > { %v969_v19 = vpack.c.bf16 %v959_v16, %v957_v15  ;;  %v942_v22 = vadd.f32 %v941_v18, %v672_v40  ;;  %v960_v30 = vmax.f32 %v940_v24, 0.0 }
 0x13e   : > { %v943_v21 = vpop.f32.mrf.mxu0 }
 0x13f   : > { %v944_v23 = vadd.f32 %v943_v21, %v668_v41  ;;  %1228 = vmatprep.mubr.bf16.mxu1 %v969_v19  ;;  %v961_v28 = vmax.f32 %v942_v22, 0.0  ;;  %v1004_v41 = vld [vmem:[%s4966_s5] sm:$0x3] }
 0x140   : > { %v945_v25 = vpop.f32.mrf.mxu0  ;;  %1229 = vmatmul.mubr.bf16.gmra.mxu1 %v968_v20  ;;  %v1013_v43 = vrot.slane %v1004_v41, %v4269_v36  ;;  %v1009_v44 = vrot.slane %v1004_v41, %v4271_v37  ;;  %v3464_v41 = vld [vmem:[%s4923_s8 + $0x60] ss:$8 sps:$4 sm:$0xff]  }
 0x141   : > { %v946_v26 = vadd.f32 %v945_v25, %v672_v40  ;;  %v962_v27 = vmax.f32 %v944_v23, 0.0  ;;  %v3458_v40 = vld [vmem:[%s4921_s6 + $0x80] ss:$8 sps:$4 sm:$0xff]  }
 0x142   : > { %1508 = vmatpush2.bf16.msra.mxu0 %v3458_v40  ;;  %v3466_v40 = vld [vmem:[%s4923_s8 + $0x64] ss:$8 sps:$4 sm:$0xff]  }
 0x143   : > { %v963_v29 = vmax.f32 %v946_v26, 0.0  ;;  %v970_v32 = vpack.c.bf16 %v962_v27, %v960_v30  ;;  %1728 = vmatprep.subr.bf16.mxu1 %v3466_v40 }
 0x144   : > { %1729 = vmatpush1.bf16.msra.mxu1 %v3464_v41 }
 0x145   : > { %v971_v31 = vpack.c.bf16 %v963_v29, %v961_v28 }
 0x147   : > { %1238 = vmatprep.mubr.bf16.mxu1 %v971_v31 }
 0x148   : > { %1239 = vmatmul.mubr.bf16.gmra.mxu1 %v970_v32 }
 0x1f0   : > { %v1210_v42 = vpop.f32.mrf.mxu1 }
 0x1f1   : > { %v1211_v49 = vadd.f32 %v1210_v42, %v1009_v44  ;;  %v3469_v42 = vld [vmem:[%s4923_s8 + $0x54] ss:$8 sps:$4 sm:$0xff]  }
 0x1f2   : > { %v1212_v45 = vpop.f32.mrf.mxu1  ;;  %1730 = vmatprep.subr.bf16.mxu1 %v3469_v42 }
 0x1f3   : > { %v1213_v47 = vadd.f32 %v1212_v45, %v1013_v43  ;;  %v1249_v56 = vmax.f32 %v1211_v49, 0.0  ;;  %v3470_v45 = vld [vmem:[%s4923_s8 + $0x40] ss:$8 sps:$4 sm:$0xff]  }
 0x1f4   : > { %v1214_v46 = vpop.f32.mrf.mxu1  ;;  %v3476_v49 = vld [vmem:[%s4923_s8 + $0x20] ss:$8 sps:$4 sm:$0xff]  }
 0x1f5   : > { %v1215_v48 = vadd.f32 %v1214_v46, %v1009_v44  ;;  %v1250_v54 = vmax.f32 %v1213_v47, 0.0  ;;  %v3475_v46 = vld [vmem:[%s4923_s8 + $0x34] ss:$8 sps:$4 sm:$0xff]   ;;  %v3473_v47 = vld [vmem:[%s4923_s8 + $0x30] ss:$8 sps:$4 sm:$0xff]  }
 0x1f6   : > { %v1216_v50 = vpop.f32.mrf.mxu1 }
 0x1f7   : > { %v1217_v51 = vadd.f32 %v1216_v50, %v1013_v43  ;;  %v1251_v52 = vmax.f32 %v1215_v48, 0.0  ;;  %v3478_v48 = vld [vmem:[%s4923_s8 + $0x24] ss:$8 sps:$4 sm:$0xff]   ;;  %v3481_v50 = vld [vmem:[%s4923_s8 + $0x14] ss:$8 sps:$4 sm:$0xff]  }
 0x1f8   : > { %v1220_v53 = vpop.f32.mrf.mxu1 }
 0x1f9   : > { %v1252_v55 = vmax.f32 %v1217_v51, 0.0  ;;  %v1265_v59 = vpack.c.bf16 %v1251_v52, %v1249_v56  ;;  %v1221_v63 = vadd.f32 %v1220_v53, %v1009_v44  ;;  %v3479_v51 = vld [vmem:[%s4923_s8 + $0x10] ss:$8 sps:$4 sm:$0xff]   ;;  %v3484_v52 = vld [vmem:[%s4923_s8 + $0x4] ss:$8 sps:$4 sm:$0xff]  }
 0x1fa   : > { %v1222_v57 = vpop.f32.mrf.mxu1  ;;  %v3482_v53 = vld [vmem:[%s4923_s8] ss:$8 sps:$4 sm:$0xff]  }
 0x1fb   : > { %v1266_v58 = vpack.c.bf16 %v1252_v55, %v1250_v54  ;;  %v1223_v61 = vadd.f32 %v1222_v57, %v1013_v43  ;;  %v1253_v6 = vmax.f32 %v1221_v63, 0.0  ;;  %v3827_v54 = vmov 0   ;;  %v3487_v55 = vld [vmem:[%s4925_s10 + $0x74] ss:$8 sps:$4 sm:$0xff]   ;;  %v1305_v56 = vld [vmem:[%s4922_s7] sm:$0x3] }
 0x1fc   : > { %v1224_v60 = vpop.f32.mrf.mxu1  ;;  %1758 = vmatprep.mubr.bf16.mxu1 %v3827_v54  ;;  %v4361_v57 = vrot.slane %v1305_v56, %v4271_v37 }
 0x1fd   : > { %v1225_v62 = vadd.f32 %v1224_v60, %v1009_v44  ;;  %1509 = vmatprep.mubr.bf16.mxu0 %v1266_v58  ;;  %v1254_v4 = vmax.f32 %v1223_v61, 0.0  ;;  %v4364_v58 = vrot.slane %v1305_v56, %v4269_v36  ;;  %v3490_v56 = vld [vmem:[%s4925_s10 + $0x64] ss:$8 sps:$4 sm:$0xff]  }
 0x1fe   : > { %v1226_v0 = vpop.f32.mrf.mxu1  ;;  %1510 = vmatmul.mubr.bf16.vlgmr.msra.gmra.mxu0 %v1265_v59 }
 0x1ff   : > { %v1227_v1 = vadd.f32 %v1226_v0, %v1013_v43  ;;  %v1255_v2 = vmax.f32 %v1225_v62, 0.0 }
 0x200   : > { %v1230_v3 = vpop.f32.mrf.mxu1 }
 0x201   : > { %v1256_v5 = vmax.f32 %v1227_v1, 0.0  ;;  %v1267_v9 = vpack.c.bf16 %v1255_v2, %v1253_v6  ;;  %v1231_v13 = vadd.f32 %v1230_v3, %v1009_v44 }
 0x202   : > { %v1232_v7 = vpop.f32.mrf.mxu1 }
 0x203   : > { %v1268_v8 = vpack.c.bf16 %v1256_v5, %v1254_v4  ;;  %v1233_v11 = vadd.f32 %v1232_v7, %v1013_v43  ;;  %v1257_v20 = vmax.f32 %v1231_v13, 0.0 }
 0x204   : > { %v1234_v10 = vpop.f32.mrf.mxu1 }
 0x205   : > { %v1235_v12 = vadd.f32 %v1234_v10, %v1009_v44  ;;  %1519 = vmatprep.mubr.bf16.mxu0 %v1268_v8  ;;  %v1258_v18 = vmax.f32 %v1233_v11, 0.0 }
 0x206   : > { %v1236_v14 = vpop.f32.mrf.mxu1  ;;  %1520 = vmatmul.mubr.bf16.gmra.mxu0 %v1267_v9 }
 0x207   : > { %v1237_v15 = vadd.f32 %v1236_v14, %v1013_v43  ;;  %v1259_v16 = vmax.f32 %v1235_v12, 0.0 }
 0x208   : > { %v1240_v17 = vpop.f32.mrf.mxu1 }
 0x209   : > { %v1260_v19 = vmax.f32 %v1237_v15, 0.0  ;;  %v1269_v23 = vpack.c.bf16 %v1259_v16, %v1257_v20  ;;  %v1241_v27 = vadd.f32 %v1240_v17, %v1009_v44 }
 0x20a   : > { %v1242_v21 = vpop.f32.mrf.mxu1 }
 0x20b   : > { %v1270_v22 = vpack.c.bf16 %v1260_v19, %v1258_v18  ;;  %v1243_v25 = vadd.f32 %v1242_v21, %v1013_v43  ;;  %v1261_v33 = vmax.f32 %v1241_v27, 0.0 }
 0x20c   : > { %v1244_v24 = vpop.f32.mrf.mxu1 }
 0x20d   : > { %v1245_v26 = vadd.f32 %v1244_v24, %v1009_v44  ;;  %1529 = vmatprep.mubr.bf16.mxu0 %v1270_v22  ;;  %v1262_v31 = vmax.f32 %v1243_v25, 0.0  ;;  %v3472_v44 = vld [vmem:[%s4923_s8 + $0x44] ss:$8 sps:$4 sm:$0xff]  }
 0x20e   : > { %v1246_v28 = vpop.f32.mrf.mxu1  ;;  %1530 = vmatmul.mubr.bf16.gmra.mxu0 %v1269_v23 }
 0x20f   : > { %v1247_v29 = vadd.f32 %v1246_v28, %v1013_v43  ;;  %v1263_v30 = vmax.f32 %v1245_v26, 0.0  ;;  %v3467_v43 = vld [vmem:[%s4923_s8 + $0x50] ss:$8 sps:$4 sm:$0xff]   ;;  %v1590_v26 = vld [vmem:[%s4406_s1] sm:$0xff] }
 0x210   : > { %1731 = vmatpush1.bf16.msra.mxu1 %v3467_v43 }
 0x211   : > { %v1264_v32 = vmax.f32 %v1247_v29, 0.0  ;;  %v1271_v35 = vpack.c.bf16 %v1263_v30, %v1261_v33  ;;  %1732 = vmatprep.subr.bf16.mxu1 %v3472_v44 }
 0x213   : > { %v1272_v34 = vpack.c.bf16 %v1264_v32, %v1262_v31  ;;  %v1591_v32 = vld [vmem:[%s4406_s1 + $0x8] sm:$0xff] }
 0x214   : > { %1733 = vmatpush1.bf16.msra.mxu1 %v3470_v45 }
 0x215   : > { %1539 = vmatprep.mubr.bf16.mxu0 %v1272_v34  ;;  %1734 = vmatprep.subr.bf16.mxu1 %v3475_v46 }
 0x216   : > { %1540 = vmatmul.mubr.bf16.gmra.mxu0 %v1271_v35 }
 0x218   : > { %1735 = vmatpush1.bf16.msra.mxu1 %v3473_v47 }
 0x219   : > { %1736 = vmatprep.subr.bf16.mxu1 %v3478_v48 }
 0x21c   : > { %1737 = vmatpush1.bf16.msra.mxu1 %v3476_v49 }
 0x21d   : > { %1738 = vmatprep.subr.bf16.mxu1 %v3481_v50  ;;  %v1592_v50 = vld [vmem:[%s4406_s1 + $0x10] sm:$0xff] }
 0x220   : > { %1739 = vmatpush1.bf16.msra.mxu1 %v3479_v51  ;;  %v3485_v51 = vld [vmem:[%s4925_s10 + $0x70] ss:$8 sps:$4 sm:$0xff]  }
 0x221   : > { %1740 = vmatprep.subr.bf16.mxu1 %v3484_v52 }
 0x224   : > { %1741 = vmatpush1.bf16.msra.mxu1 %v3482_v53 }
 0x225   : > { %2027 = vmatprep.subr.bf16.mxu1 %v3487_v55 }
 0x2be   : > { %v1511_v59 = vpop.f32.mrf.mxu0 }
 0x2bf   : > { %v4367_v60 = vadd.f32 %v1511_v59, %v4361_v57 }
 0x2c0   : > { %v1513_v61 = vpop.f32.mrf.mxu0 }
 0x2c1   : > { %1550 = vst [vmem:[%s4369_s16] sm:$0xff] %v4367_v60  ;;  %v1514_v62 = vadd.f32 %v1513_v61, %v4364_v58 }
 0x2c2   : > { %v1515_v63 = vpop.f32.mrf.mxu0 }
 0x2c3   : > { %1558 = vst [vmem:[%s4374_s23] sm:$0xff] %v1514_v62  ;;  %v1566_v0 = vmul.f32 0.5, %v1514_v62  ;;  %v4378_v1 = vadd.f32 %v1515_v63, %v4361_v57 }
 0x2c4   : > { %v1517_v2 = vpop.f32.mrf.mxu0 }
 0x2c5   : > { %v1574_v3 = vmul.f32 1.442695, %v1566_v0  ;;  %1551 = vst [vmem:[%s4369_s16 + $0x8] sm:$0xff] %v4378_v1  ;;  %v1518_v4 = vadd.f32 %v1517_v2, %v4364_v58  ;;  %v3493_v0 = vld [vmem:[%s4925_s10 + $0x54] ss:$8 sps:$4 sm:$0xff]  }
 0x2c6   : > { %v1521_v5 = vpop.f32.mrf.mxu0 }
 0x2c7   : > { %3629 = vpow2.f32 %v1574_v3  ;;  %1559 = vst [vmem:[%s4374_s23 + $0x8] sm:$0xff] %v1518_v4  ;;  %v1567_v6 = vmul.f32 0.5, %v1518_v4  ;;  %v4385_v7 = vadd.f32 %v1521_v5, %v4361_v57  ;;  %v1594_v4 = vld [vmem:[%s4406_s1 + $0x20] sm:$0xff]  ;;  %v3491_v5 = vld [vmem:[%s4925_s10 + $0x50] ss:$8 sps:$4 sm:$0xff]  }
 0x2c8   : > { %v1523_v8 = vpop.f32.mrf.mxu0 }
 0x2c9   : > { %v1576_v9 = vmul.f32 1.442695, %v1567_v6  ;;  %1552 = vst [vmem:[%s4369_s16 + $0x10] sm:$0xff] %v4385_v7  ;;  %v1524_v10 = vadd.f32 %v1523_v8, %v4364_v58  ;;  %v3496_v8 = vld [vmem:[%s4925_s10 + $0x44] ss:$8 sps:$4 sm:$0xff]  }
 0x2ca   : > { %v1525_v11 = vpop.f32.mrf.mxu0 }
 0x2cb   : > { %3631 = vpow2.f32 %v1576_v9  ;;  %1560 = vst [vmem:[%s4374_s23 + $0x10] sm:$0xff] %v1524_v10  ;;  %v1568_v12 = vmul.f32 0.5, %v1524_v10  ;;  %v4392_v13 = vadd.f32 %v1525_v11, %v4361_v57  ;;  %v1595_v9 = vld [vmem:[%s4406_s1 + $0x28] sm:$0xff] }
 0x2cc   : > { %v1527_v14 = vpop.f32.mrf.mxu0  ;;  %v3494_v11 = vld [vmem:[%s4925_s10 + $0x40] ss:$8 sps:$4 sm:$0xff]  }
 0x2cd   : > { %v1578_v15 = vmul.f32 1.442695, %v1568_v12  ;;  %1553 = vst [vmem:[%s4369_s16 + $0x18] sm:$0xff] %v4392_v13  ;;  %v1528_v16 = vadd.f32 %v1527_v14, %v4364_v58 }
 0x2ce   : > { %v1531_v17 = vpop.f32.mrf.mxu0 }
 0x2cf   : > { %3633 = vpow2.f32 %v1578_v15  ;;  %1561 = vst [vmem:[%s4374_s23 + $0x18] sm:$0xff] %v1528_v16  ;;  %v1569_v18 = vmul.f32 0.5, %v1528_v16  ;;  %v4399_v19 = vadd.f32 %v1531_v17, %v4361_v57  ;;  %v1596_v17 = vld [vmem:[%s4406_s1 + $0x30] sm:$0xff] }
 0x2d0   : > { %v1533_v20 = vpop.f32.mrf.mxu0 }
 0x2d1   : > { %v1580_v21 = vmul.f32 1.442695, %v1569_v18  ;;  %1554 = vst [vmem:[%s4369_s16 + $0x20] sm:$0xff] %v4399_v19  ;;  %v1534_v22 = vadd.f32 %v1533_v20, %v4364_v58  ;;  %v3497_v18 = vld [vmem:[%s4925_s10 + $0x30] ss:$8 sps:$4 sm:$0xff]  }
 0x2d2   : > { %v1535_v23 = vpop.f32.mrf.mxu0 }
 0x2d3   : > { %3635 = vpow2.f32 %v1580_v21  ;;  %1562 = vst [vmem:[%s4374_s23 + $0x20] sm:$0xff] %v1534_v22  ;;  %v1570_v24 = vmul.f32 0.5, %v1534_v22  ;;  %v4413_v25 = vadd.f32 %v1535_v23, %v4361_v57  ;;  %v3502_v21 = vld [vmem:[%s4925_s10 + $0x24] ss:$8 sps:$4 sm:$0xff]   ;;  %v1597_v22 = vld [vmem:[%s4406_s1 + $0x38] sm:$0xff] }
 0x2d4   : > { %v3630_v27 = vpop.eup %3629  ;;  %v1537_v28 = vpop.f32.mrf.mxu0 }
 0x2d5   : > { %v1582_v29 = vmul.f32 1.442695, %v1570_v24  ;;  %1555 = vst [vmem:[%s4369_s16 + $0x28] sm:$0xff] %v4413_v25  ;;  %v1538_v30 = vadd.f32 %v1537_v28, %v4364_v58  ;;  %v1598_v33 = vmul.f32 %v3630_v27, %v1590_v26  ;;  %v3505_v26 = vld [vmem:[%s4925_s10 + $0x14] ss:$8 sps:$4 sm:$0xff]  }
 0x2d6   : > { %v1541_v31 = vpop.f32.mrf.mxu0 }
 0x2d7   : > { %3637 = vpow2.f32 %v1582_v29  ;;  %1563 = vst [vmem:[%s4374_s23 + $0x28] sm:$0xff] %v1538_v30  ;;  %v1571_v34 = vmul.f32 0.5, %v1538_v30  ;;  %v4422_v35 = vadd.f32 %v1541_v31, %v4361_v57  ;;  %v1606_v44 = vadd.f32 %v1598_v33, %v4367_v60  ;;  %v3508_v30 = vld [vmem:[%s4925_s10 + $0x4] ss:$8 sps:$4 sm:$0xff]   ;;  %v3506_v31 = vld [vmem:[%s4925_s10] ss:$8 sps:$4 sm:$0xff]  }
 0x2d8   : > { %v3632_v38 = vpop.eup %3631  ;;  %v1543_v39 = vpop.f32.mrf.mxu0  ;;  %v3509_v33 = vld [vmem:[%s4925_s10 + $0xf0] ss:$8 sps:$4 sm:$0xff]  }
 0x2d9   : > { %v1584_v40 = vmul.f32 1.442695, %v1571_v34  ;;  %1556 = vst [vmem:[%s4369_s16 + $0x30] sm:$0xff] %v4422_v35  ;;  %v1544_v41 = vadd.f32 %v1543_v39, %v4364_v58  ;;  %v1599_v42 = vmul.f32 %v3632_v38, %v1591_v32  ;;  %v3511_v32 = vld [vmem:[%s4925_s10 + $0xf4] ss:$8 sps:$4 sm:$0xff]  }
 0x2da   : > { %v1545_v43 = vpop.f32.mrf.mxu0  ;;  %v3514_v34 = vld [vmem:[%s4925_s10 + $0xe4] ss:$8 sps:$4 sm:$0xff]   ;;  %v3517_v38 = vld [vmem:[%s4925_s10 + $0xd4] ss:$8 sps:$4 sm:$0xff]   ;;  %v3515_v39 = vld [vmem:[%s4925_s10 + $0xd0] ss:$8 sps:$4 sm:$0xff]  }
 0x2db   : > { %3639 = vpow2.f32 %v1584_v40  ;;  %1564 = vst [vmem:[%s4374_s23 + $0x30] sm:$0xff] %v1544_v41  ;;  %v1572_v45 = vmul.f32 0.5, %v1544_v41  ;;  %v4430_v46 = vadd.f32 %v1545_v43, %v4361_v57  ;;  %v1607_v47 = vadd.f32 %v1599_v42, %v4378_v1  ;;  %v1593_v57 = vld [vmem:[%s4406_s1 + $0x18] sm:$0xff]  ;;  %v3520_v40 = vld [vmem:[%s4925_s10 + $0xc4] ss:$8 sps:$4 sm:$0xff]   ;;  %s4765_s1 = scalar_lea.sflag [#allocation5], %s2819_s19 }
 0x2dc   : > { %v3634_v48 = vpop.eup %3633  ;;  %v1547_v49 = vpop.f32.mrf.mxu0  ;;  %v3518_v41 = vld [vmem:[%s4925_s10 + $0xc0] ss:$8 sps:$4 sm:$0xff]   ;;  %v3523_v42 = vld [vmem:[%s4925_s10 + $0xb4] ss:$8 sps:$4 sm:$0xff]   ;;  %v3521_v43 = vld [vmem:[%s4925_s10 + $0xb0] ss:$8 sps:$4 sm:$0xff]  }
 0x2dd   : > { %v1586_v52 = vmul.f32 1.442695, %v1572_v45  ;;  %1557 = vst [vmem:[%s4369_s16 + $0x38] sm:$0xff] %v4430_v46  ;;  %v1548_v53 = vadd.f32 %v1547_v49, %v4364_v58  ;;  %v1614_v55 = vpack.c.bf16 %v1607_v47, %v1606_v44  ;;  %v1600_v60 = vmul.f32 %v3634_v48, %v1592_v50  ;;  %v3488_v58 = vld [vmem:[%s4925_s10 + $0x60] ss:$8 sps:$4 sm:$0xff]  }
 0x2de   : > { %v3526_v44 = vld [vmem:[%s4925_s10 + $0xa4] ss:$8 sps:$4 sm:$0xff]   ;;  %v3524_v45 = vld [vmem:[%s4925_s10 + $0xa0] ss:$8 sps:$4 sm:$0xff]   ;;  %v3527_v47 = vld [vmem:[%s4925_s10 + $0x90] ss:$8 sps:$4 sm:$0xff]  }
 0x2df   : > { %3641 = vpow2.f32 %v1586_v52  ;;  %1565 = vst [vmem:[%s4374_s23 + $0x38] sm:$0xff] %v1548_v53  ;;  %v1573_v59 = vmul.f32 0.5, %v1548_v53  ;;  %1759 = vmatmul.mubr.bf16.vlgmr.msra.gmra.mxu1 %v1614_v55  ;;  %v1608_v1 = vadd.f32 %v1600_v60, %v4385_v7  ;;  %v3532_v48 = vld [vmem:[%s4925_s10 + $0x84] ss:$8 sps:$4 sm:$0xff]   ;;  %v3530_v49 = vld [vmem:[%s4925_s10 + $0x80] ss:$8 sps:$4 sm:$0xff]  }
 0x2e0   : > { %v3636_v61 = vpop.eup %3635  ;;  %1768 = vmatprep.mubr.bf16.mxu1 %v3827_v54  ;;  %2028 = vmatpush1.bf16.msra.mxu1 %v3485_v51  ;;  %v3533_v50 = vld [vmem:[%s4927_s12 + $0x70] ss:$8 sps:$4 sm:$0xff]   ;;  %v3535_v51 = vld [vmem:[%s4927_s12 + $0x74] ss:$8 sps:$4 sm:$0xff]   ;;  %v3538_v52 = vld [vmem:[%s4927_s12 + $0x64] ss:$8 sps:$4 sm:$0xff]  }
 0x2e1   : > { %v1588_v62 = vmul.f32 1.442695, %v1573_v59  ;;  %v1601_v63 = vmul.f32 %v3636_v61, %v1593_v57  ;;  %2029 = vmatprep.subr.bf16.mxu1 %v3490_v56  ;;  %2328 = vmatprep.subr.bf16.mxu0 %v3535_v51  ;;  %v3536_v53 = vld [vmem:[%s4927_s12 + $0x60] ss:$8 sps:$4 sm:$0xff]   ;;  %v3541_v55 = vld [vmem:[%s4927_s12 + $0x54] ss:$8 sps:$4 sm:$0xff]  }
 0x2e2   : > { %2329 = vmatpush1.bf16.msra.mxu0 %v3533_v50  ;;  %v3539_v56 = vld [vmem:[%s4927_s12 + $0x50] ss:$8 sps:$4 sm:$0xff]   ;;  %v3544_v57 = vld [vmem:[%s4927_s12 + $0x44] ss:$8 sps:$4 sm:$0xff]   ;;  %v3542_v59 = vld [vmem:[%s4927_s12 + $0x40] ss:$8 sps:$4 sm:$0xff]  }
 0x2e3   : > { %3643 = vpow2.f32 %v1588_v62  ;;  %v1609_v2 = vadd.f32 %v1601_v63, %v4392_v13  ;;  %v3499_v13 = vld [vmem:[%s4925_s10 + $0x34] ss:$8 sps:$4 sm:$0xff]   ;;  %2330 = vmatprep.subr.bf16.mxu0 %v3538_v52  ;;  %v3545_v61 = vld [vmem:[%s4927_s12 + $0x30] ss:$8 sps:$4 sm:$0xff]   ;;  %v3548_v62 = vld [vmem:[%s4927_s12 + $0x20] ss:$8 sps:$4 sm:$0xff]  }
 0x2e4   : > { %v3638_v3 = vpop.eup %3637  ;;  %2030 = vmatpush1.bf16.msra.mxu1 %v3488_v58  ;;  %v3547_v60 = vld [vmem:[%s4927_s12 + $0x34] ss:$8 sps:$4 sm:$0xff]   ;;  %v3550_v58 = vld [vmem:[%s4927_s12 + $0x24] ss:$8 sps:$4 sm:$0xff]  }
 0x2e5   : > { %v1615_v6 = vpack.c.bf16 %v1609_v2, %v1608_v1  ;;  %2031 = vmatprep.subr.bf16.mxu1 %v3493_v0  ;;  %v1602_v10 = vmul.f32 %v3638_v3, %v1594_v4  ;;  %v3553_v63 = vld [vmem:[%s4927_s12 + $0x14] ss:$8 sps:$4 sm:$0xff]   ;;  %v3551_v0 = vld [vmem:[%s4927_s12 + $0x10] ss:$8 sps:$4 sm:$0xff]   ;;  %v3556_v1 = vld [vmem:[%s4927_s12 + $0x4] ss:$8 sps:$4 sm:$0xff]  }
 0x2e6   : > { %2331 = vmatpush1.bf16.msra.mxu0 %v3536_v53  ;;  %v3554_v2 = vld [vmem:[%s4927_s12] ss:$8 sps:$4 sm:$0xff]   ;;  %v3559_v3 = vld [vmem:[%s4927_s12 + $0xf4] ss:$8 sps:$4 sm:$0xff]   ;;  %v3557_v4 = vld [vmem:[%s4927_s12 + $0xf0] ss:$8 sps:$4 sm:$0xff]  }
 0x2e7   : > { %1769 = vmatmul.mubr.bf16.gmra.mxu1 %v1615_v6  ;;  %v1610_v14 = vadd.f32 %v1602_v10, %v4399_v19  ;;  %v3500_v19 = vld [vmem:[%s4925_s10 + $0x20] ss:$8 sps:$4 sm:$0xff]   ;;  %2332 = vmatprep.subr.bf16.mxu0 %v3541_v55  ;;  %v3568_v10 = vld [vmem:[%s4927_s12 + $0xc4] ss:$8 sps:$4 sm:$0xff]  }
 0x2e8   : > { %v3640_v7 = vpop.eup %3639  ;;  %1778 = vmatprep.mubr.bf16.mxu1 %v3827_v54  ;;  %2032 = vmatpush1.bf16.msra.mxu1 %v3491_v5  ;;  %v3562_v5 = vld [vmem:[%s4927_s12 + $0xe4] ss:$8 sps:$4 sm:$0xff]   ;;  %v3560_v6 = vld [vmem:[%s4927_s12 + $0xe0] ss:$8 sps:$4 sm:$0xff]  }
 0x2e9   : > { %v1603_v12 = vmul.f32 %v3640_v7, %v1595_v9  ;;  %2033 = vmatprep.subr.bf16.mxu1 %v3496_v8  ;;  %v3565_v8 = vld [vmem:[%s4927_s12 + $0xd4] ss:$8 sps:$4 sm:$0xff]   ;;  %v3563_v9 = vld [vmem:[%s4927_s12 + $0xd0] ss:$8 sps:$4 sm:$0xff]   ;;  %v3566_v7 = vld [vmem:[%s4927_s12 + $0xc0] ss:$8 sps:$4 sm:$0xff]  }
 0x2ea   : > { %2333 = vmatpush1.bf16.msra.mxu0 %v3539_v56 }
 0x2eb   : > { %v1611_v15 = vadd.f32 %v1603_v12, %v4413_v25  ;;  %2334 = vmatprep.subr.bf16.mxu0 %v3544_v57  ;;  %v3569_v12 = vld [vmem:[%s4927_s12 + $0xb0] ss:$8 sps:$4 sm:$0xff]  }
 0x2ec   : > { %v3642_v16 = vpop.eup %3641  ;;  %2034 = vmatpush1.bf16.msra.mxu1 %v3494_v11  ;;  %v3571_v11 = vld [vmem:[%s4927_s12 + $0xb4] ss:$8 sps:$4 sm:$0xff]  }
 0x2ed   : > { %v1616_v20 = vpack.c.bf16 %v1611_v15, %v1610_v14  ;;  %2035 = vmatprep.subr.bf16.mxu1 %v3499_v13  ;;  %v1604_v23 = vmul.f32 %v3642_v16, %v1596_v17  ;;  %v1634_v13 = vld [vmem:[%s4924_s9] sm:$0x3] }
 0x2ee   : > { %2335 = vmatpush1.bf16.msra.mxu0 %v3542_v59  ;;  %v1643_v15 = vrot.slane %v1634_v13, %v4269_v36  ;;  %v1639_v16 = vrot.slane %v1634_v13, %v4271_v37  ;;  %v3575_v13 = vld [vmem:[%s4927_s12 + $0x90] ss:$8 sps:$4 sm:$0xff]  }
 0x2ef   : > { %1779 = vmatmul.mubr.bf16.gmra.mxu1 %v1616_v20  ;;  %v1612_v27 = vadd.f32 %v1604_v23, %v4422_v35  ;;  %v3512_v35 = vld [vmem:[%s4925_s10 + $0xe0] ss:$8 sps:$4 sm:$0xff]   ;;  %2336 = vmatprep.subr.bf16.mxu0 %v3547_v60 }
 0x2f0   : > { %v3644_v24 = vpop.eup %3643  ;;  %1788 = vmatprep.mubr.bf16.mxu1 %v3827_v54  ;;  %2036 = vmatpush1.bf16.msra.mxu1 %v3497_v18  ;;  %v3503_v54 = vld [vmem:[%s4925_s10 + $0x10] ss:$8 sps:$4 sm:$0xff]  }
 0x2f1   : > { %v1605_v25 = vmul.f32 %v3644_v24, %v1597_v22  ;;  %2037 = vmatprep.subr.bf16.mxu1 %v3502_v21 }
 0x2f2   : > { %2337 = vmatpush1.bf16.msra.mxu0 %v3545_v61 }
 0x2f3   : > { %v1613_v28 = vadd.f32 %v1605_v25, %v4430_v46  ;;  %v3529_v46 = vld [vmem:[%s4925_s10 + $0x94] ss:$8 sps:$4 sm:$0xff]   ;;  %2338 = vmatprep.subr.bf16.mxu0 %v3550_v58 }
 0x2f4   : > { %2038 = vmatpush1.bf16.msra.mxu1 %v3500_v19 }
 0x2f5   : > { %v1617_v29 = vpack.c.bf16 %v1613_v28, %v1612_v27  ;;  %2039 = vmatprep.subr.bf16.mxu1 %v3505_v26 }
 0x2f6   : > { %2339 = vmatpush1.bf16.msra.mxu0 %v3548_v62 }
 0x2f7   : > { %1789 = vmatmul.mubr.bf16.gmra.mxu1 %v1617_v29  ;;  %2340 = vmatprep.subr.bf16.mxu0 %v3553_v63 }
 0x2f8   : > { %2040 = vmatpush1.bf16.msra.mxu1 %v3503_v54 }
 0x2f9   : > { %2041 = vmatprep.subr.bf16.mxu1 %v3508_v30 }
 0x2fa   : > { %2341 = vmatpush1.bf16.msra.mxu0 %v3551_v0 }
 0x2fb   : > { %2342 = vmatprep.subr.bf16.mxu0 %v3556_v1 }
 0x2fc   : > { %2042 = vmatpush1.bf16.msra.mxu1 %v3506_v31 }
 0x2fd   : > { %2043 = vmatprep.subr.bf16.mxu1 %v3511_v32 }
 0x2fe   : > { %2343 = vmatpush1.bf16.msra.mxu0 %v3554_v2 }
 0x2ff   : > { %2344 = vmatprep.subr.bf16.mxu0 %v3559_v3 }
 0x300   : > { %2044 = vmatpush2.bf16.msra.mxu1 %v3509_v33 }
 0x301   : > { %2045 = vmatprep.subr.bf16.mxu1 %v3514_v34 }
 0x302   : > { %2345 = vmatpush2.bf16.msra.mxu0 %v3557_v4 }
 0x303   : > { %2346 = vmatprep.subr.bf16.mxu0 %v3562_v5 }
 0x304   : > { %2046 = vmatpush2.bf16.msra.mxu1 %v3512_v35 }
 0x305   : > { %2047 = vmatprep.subr.bf16.mxu1 %v3517_v38 }
 0x306   : > { %2347 = vmatpush2.bf16.msra.mxu0 %v3560_v6 }
 0x307   : > { %2348 = vmatprep.subr.bf16.mxu0 %v3565_v8 }
 0x308   : > { %2048 = vmatpush2.bf16.msra.mxu1 %v3515_v39 }
 0x309   : > { %2049 = vmatprep.subr.bf16.mxu1 %v3520_v40 }
 0x30a   : > { %2349 = vmatpush2.bf16.msra.mxu0 %v3563_v9 }
 0x30b   : > { %2350 = vmatprep.subr.bf16.mxu0 %v3568_v10 }
 0x30c   : > { %2050 = vmatpush2.bf16.msra.mxu1 %v3518_v41 }
 0x30d   : > { %2051 = vmatprep.subr.bf16.mxu1 %v3523_v42 }
 0x30e   : > { %2351 = vmatpush2.bf16.msra.mxu0 %v3566_v7  ;;  %v3574_v7 = vld [vmem:[%s4927_s12 + $0xa4] ss:$8 sps:$4 sm:$0xff]  }
 0x30f   : > { %2352 = vmatprep.subr.bf16.mxu0 %v3571_v11  ;;  %v3572_v11 = vld [vmem:[%s4927_s12 + $0xa0] ss:$8 sps:$4 sm:$0xff]  }
 0x310   : > { %2052 = vmatpush2.bf16.msra.mxu1 %v3521_v43 }
 0x311   : > { %2053 = vmatprep.subr.bf16.mxu1 %v3526_v44 }
 0x312   : > { %2353 = vmatpush2.bf16.msra.mxu0 %v3569_v12  ;;  %v3577_v12 = vld [vmem:[%s4927_s12 + $0x94] ss:$8 sps:$4 sm:$0xff]  }
 0x313   : > { %2354 = vmatprep.subr.bf16.mxu0 %v3574_v7 }
 0x314   : > { %2054 = vmatpush2.bf16.msra.mxu1 %v3524_v45 }
 0x315   : > { %2055 = vmatprep.subr.bf16.mxu1 %v3529_v46 }
 0x316   : > { %2355 = vmatpush2.bf16.msra.mxu0 %v3572_v11 }
 0x317   : > { %2356 = vmatprep.subr.bf16.mxu0 %v3577_v12 }
 0x318   : > { %2056 = vmatpush2.bf16.msra.mxu1 %v3527_v47 }
 0x319   : > { %2057 = vmatprep.subr.bf16.mxu1 %v3532_v48 }
 0x31a   : > { %2357 = vmatpush2.bf16.msra.mxu0 %v3575_v13 }
 0x31c   : > { %2058 = vmatpush2.bf16.msra.mxu1 %v3530_v49 }
 0x39f   : > { %v1760_v14 = vpop.f32.mrf.mxu1 }
 0x3a0   : > { %v1761_v22 = vadd.f32 %v1760_v14, %v1639_v16  ;;  %v3580_v14 = vld [vmem:[%s4927_s12 + $0x84] ss:$8 sps:$4 sm:$0xff]  }
 0x3a1   : > { %v1762_v17 = vpop.f32.mrf.mxu1  ;;  %2358 = vmatprep.subr.bf16.mxu0 %v3580_v14 }
 0x3a2   : > { %v1763_v20 = vadd.f32 %v1762_v17, %v1643_v15  ;;  %v1799_v28 = vmax.f32 %v1761_v22, 0.0  ;;  %v3583_v17 = vld [vmem:[%s4929_s14 + $0x74] ss:$8 sps:$4 sm:$0xff]   ;;  %v3587_v22 = vld [vmem:[%s4929_s14 + $0x50] ss:$8 sps:$4 sm:$0xff]  }
 0x3a3   : > { %v1764_v18 = vpop.f32.mrf.mxu1  ;;  %2629 = vmatprep.subr.bf16.mxu1 %v3583_v17 }
 0x3a4   : > { %v1765_v21 = vadd.f32 %v1764_v18, %v1639_v16  ;;  %v1800_v26 = vmax.f32 %v1763_v20, 0.0  ;;  %v3586_v18 = vld [vmem:[%s4929_s14 + $0x64] ss:$8 sps:$4 sm:$0xff]   ;;  %v3584_v20 = vld [vmem:[%s4929_s14 + $0x60] ss:$8 sps:$4 sm:$0xff]  }
 0x3a5   : > { %v1766_v23 = vpop.f32.mrf.mxu1 }
 0x3a6   : > { %v1767_v24 = vadd.f32 %v1766_v23, %v1643_v15  ;;  %v1801_v19 = vmax.f32 %v1765_v21, 0.0  ;;  %v3589_v21 = vld [vmem:[%s4929_s14 + $0x54] ss:$8 sps:$4 sm:$0xff]   ;;  %v3592_v23 = vld [vmem:[%s4929_s14 + $0x44] ss:$8 sps:$4 sm:$0xff]  }
 0x3a7   : > { %v1770_v25 = vpop.f32.mrf.mxu1 }
 0x3a8   : > { %v1802_v27 = vmax.f32 %v1767_v24, 0.0  ;;  %v1815_v30 = vpack.c.bf16 %v1801_v19, %v1799_v28  ;;  %v1771_v34 = vadd.f32 %v1770_v25, %v1639_v16  ;;  %v3590_v24 = vld [vmem:[%s4929_s14 + $0x40] ss:$8 sps:$4 sm:$0xff]   ;;  %v3595_v19 = vld [vmem:[%s4929_s14 + $0x34] ss:$8 sps:$4 sm:$0xff]  }
 0x3a9   : > { %v1772_v54 = vpop.f32.mrf.mxu1  ;;  %v3593_v25 = vld [vmem:[%s4929_s14 + $0x30] ss:$8 sps:$4 sm:$0xff]   ;;  %v3601_v28 = vld [vmem:[%s4929_s14 + $0x14] ss:$8 sps:$4 sm:$0xff]  }
 0x3aa   : > { %v1816_v29 = vpack.c.bf16 %v1802_v27, %v1800_v26  ;;  %v1773_v32 = vadd.f32 %v1772_v54, %v1643_v15  ;;  %v1803_v43 = vmax.f32 %v1771_v34, 0.0  ;;  %v3598_v26 = vld [vmem:[%s4929_s14 + $0x24] ss:$8 sps:$4 sm:$0xff]   ;;  %v3596_v27 = vld [vmem:[%s4929_s14 + $0x20] ss:$8 sps:$4 sm:$0xff]  }
 0x3ab   : > { %v1774_v31 = vpop.f32.mrf.mxu1  ;;  %v3599_v54 = vld [vmem:[%s4929_s14 + $0x10] ss:$8 sps:$4 sm:$0xff]   ;;  %v3608_v34 = vld [vmem:[%s4929_s14 + $0xe0] ss:$8 sps:$4 sm:$0xff]  }
 0x3ac   : > { %v1775_v33 = vadd.f32 %v1774_v31, %v1639_v16  ;;  %2059 = vmatprep.mubr.bf16.mxu1 %v1816_v29  ;;  %v1804_v41 = vmax.f32 %v1773_v32, 0.0  ;;  %v3604_v29 = vld [vmem:[%s4929_s14 + $0x4] ss:$8 sps:$4 sm:$0xff]   ;;  %v3607_v31 = vld [vmem:[%s4929_s14 + $0xf4] ss:$8 sps:$4 sm:$0xff]  }
 0x3ad   : > { %v1776_v35 = vpop.f32.mrf.mxu1  ;;  %2060 = vmatmul.mubr.bf16.vlgmr.msra.gmra.mxu1 %v1815_v30  ;;  %v3602_v30 = vld [vmem:[%s4929_s14] ss:$8 sps:$4 sm:$0xff]   ;;  %v3605_v32 = vld [vmem:[%s4929_s14 + $0xf0] ss:$8 sps:$4 sm:$0xff]  }
 0x3ae   : > { %v1777_v38 = vadd.f32 %v1776_v35, %v1643_v15  ;;  %v1805_v39 = vmax.f32 %v1775_v33, 0.0  ;;  %v3610_v33 = vld [vmem:[%s4929_s14 + $0xe4] ss:$8 sps:$4 sm:$0xff]   ;;  %v3613_v35 = vld [vmem:[%s4929_s14 + $0xd4] ss:$8 sps:$4 sm:$0xff]  }
 0x3af   : > { %v1780_v40 = vpop.f32.mrf.mxu1 }
 0x3b0   : > { %v1806_v42 = vmax.f32 %v1777_v38, 0.0  ;;  %v1817_v46 = vpack.c.bf16 %v1805_v39, %v1803_v43  ;;  %v1781_v50 = vadd.f32 %v1780_v40, %v1639_v16  ;;  %v3611_v38 = vld [vmem:[%s4929_s14 + $0xd0] ss:$8 sps:$4 sm:$0xff]   ;;  %v3616_v39 = vld [vmem:[%s4929_s14 + $0xc4] ss:$8 sps:$4 sm:$0xff]  }
 0x3b1   : > { %v1782_v44 = vpop.f32.mrf.mxu1  ;;  %v3614_v40 = vld [vmem:[%s4929_s14 + $0xc0] ss:$8 sps:$4 sm:$0xff]  }
 0x3b2   : > { %v1818_v45 = vpack.c.bf16 %v1806_v42, %v1804_v41  ;;  %v1783_v48 = vadd.f32 %v1782_v44, %v1643_v15  ;;  %v1807_v59 = vmax.f32 %v1781_v50, 0.0  ;;  %v3619_v41 = vld [vmem:[%s4929_s14 + $0xb4] ss:$8 sps:$4 sm:$0xff]   ;;  %v3617_v42 = vld [vmem:[%s4929_s14 + $0xb0] ss:$8 sps:$4 sm:$0xff]  }
 0x3b3   : > { %v1784_v47 = vpop.f32.mrf.mxu1  ;;  %v1855_v43 = vld [vmem:[%s4926_s11] sm:$0x3] }
 0x3b4   : > { %v1785_v49 = vadd.f32 %v1784_v47, %v1639_v16  ;;  %2069 = vmatprep.mubr.bf16.mxu1 %v1818_v45  ;;  %v1808_v56 = vmax.f32 %v1783_v48, 0.0  ;;  %v1864_v45 = vrot.slane %v1855_v43, %v4269_v36 }
 0x3b5   : > { %v1786_v51 = vpop.f32.mrf.mxu1  ;;  %2070 = vmatmul.mubr.bf16.gmra.mxu1 %v1817_v46  ;;  %v1860_v46 = vrot.slane %v1855_v43, %v4271_v37  ;;  %v3623_v43 = vld [vmem:[%s4929_s14 + $0x90] ss:$8 sps:$4 sm:$0xff]  }
 0x3b6   : > { %v1787_v52 = vadd.f32 %v1786_v51, %v1643_v15  ;;  %v1809_v53 = vmax.f32 %v1785_v49, 0.0 }
 0x3b7   : > { %v1790_v55 = vpop.f32.mrf.mxu1 }
 0x3b8   : > { %v1810_v57 = vmax.f32 %v1787_v52, 0.0  ;;  %v1819_v58 = vpack.c.bf16 %v1809_v53, %v1807_v59  ;;  %v1791_v1 = vadd.f32 %v1790_v55, %v1639_v16 }
 0x3b9   : > { %v1792_v60 = vpop.f32.mrf.mxu1 }
 0x3ba   : > { %v1820_v61 = vpack.c.bf16 %v1810_v57, %v1808_v56  ;;  %v1793_v63 = vadd.f32 %v1792_v60, %v1643_v15  ;;  %v1811_v8 = vmax.f32 %v1791_v1, 0.0 }
 0x3bb   : > { %v1794_v62 = vpop.f32.mrf.mxu1 }
 0x3bc   : > { %v1795_v0 = vadd.f32 %v1794_v62, %v1639_v16  ;;  %2079 = vmatprep.mubr.bf16.mxu1 %v1820_v61  ;;  %v1812_v5 = vmax.f32 %v1793_v63, 0.0  ;;  %v3581_v16 = vld [vmem:[%s4929_s14 + $0x70] ss:$8 sps:$4 sm:$0xff]  }
 0x3bd   : > { %v1796_v2 = vpop.f32.mrf.mxu1  ;;  %2080 = vmatmul.mubr.bf16.gmra.mxu1 %v1819_v58 }
 0x3be   : > { %v1797_v3 = vadd.f32 %v1796_v2, %v1643_v15  ;;  %v1813_v4 = vmax.f32 %v1795_v0, 0.0  ;;  %v3578_v15 = vld [vmem:[%s4927_s12 + $0x80] ss:$8 sps:$4 sm:$0xff]   ;;  %2630 = vmatpush1.bf16.msra.mxu1 %v3581_v16 }
 0x3bf   : > { %2359 = vmatpush2.bf16.msra.mxu0 %v3578_v15  ;;  %2631 = vmatprep.subr.bf16.mxu1 %v3586_v18 }
 0x3c0   : > { %v1814_v6 = vmax.f32 %v1797_v3, 0.0  ;;  %v1821_v10 = vpack.c.bf16 %v1813_v4, %v1811_v8 }
 0x3c2   : > { %v1822_v9 = vpack.c.bf16 %v1814_v6, %v1812_v5  ;;  %2632 = vmatpush1.bf16.msra.mxu1 %v3584_v20 }
 0x3c3   : > { %2633 = vmatprep.subr.bf16.mxu1 %v3589_v21 }
 0x3c4   : > { %2089 = vmatprep.mubr.bf16.mxu1 %v1822_v9 }
 0x3c5   : > { %2090 = vmatmul.mubr.bf16.gmra.mxu1 %v1821_v10 }
 0x3c6   : > { %2634 = vmatpush1.bf16.msra.mxu1 %v3587_v22 }
 0x3c7   : > { %2635 = vmatprep.subr.bf16.mxu1 %v3592_v23 }
 0x3ca   : > { %2636 = vmatpush1.bf16.msra.mxu1 %v3590_v24 }
 0x3cb   : > { %2637 = vmatprep.subr.bf16.mxu1 %v3595_v19 }
 0x3ce   : > { %2638 = vmatpush1.bf16.msra.mxu1 %v3593_v25 }
 0x3cf   : > { %2639 = vmatprep.subr.bf16.mxu1 %v3598_v26 }
 0x3d2   : > { %2640 = vmatpush1.bf16.msra.mxu1 %v3596_v27 }
 0x3d3   : > { %2641 = vmatprep.subr.bf16.mxu1 %v3601_v28 }
 0x3d6   : > { %2642 = vmatpush1.bf16.msra.mxu1 %v3599_v54 }
 0x3d7   : > { %2643 = vmatprep.subr.bf16.mxu1 %v3604_v29 }
 0x3da   : > { %2644 = vmatpush1.bf16.msra.mxu1 %v3602_v30 }
 0x3db   : > { %2645 = vmatprep.subr.bf16.mxu1 %v3607_v31 }
 0x3de   : > { %2646 = vmatpush2.bf16.msra.mxu1 %v3605_v32 }
 0x3df   : > { %2647 = vmatprep.subr.bf16.mxu1 %v3610_v33 }
 0x3e2   : > { %2648 = vmatpush2.bf16.msra.mxu1 %v3608_v34 }
 0x3e3   : > { %2649 = vmatprep.subr.bf16.mxu1 %v3613_v35 }
 0x3e6   : > { %2650 = vmatpush2.bf16.msra.mxu1 %v3611_v38 }
 0x3e7   : > { %2651 = vmatprep.subr.bf16.mxu1 %v3616_v39 }
 0x3ea   : > { %2652 = vmatpush2.bf16.msra.mxu1 %v3614_v40  ;;  %v3622_v40 = vld [vmem:[%s4929_s14 + $0xa4] ss:$8 sps:$4 sm:$0xff]  }
 0x3eb   : > { %2653 = vmatprep.subr.bf16.mxu1 %v3619_v41  ;;  %v3620_v41 = vld [vmem:[%s4929_s14 + $0xa0] ss:$8 sps:$4 sm:$0xff]  }
 0x3ee   : > { %2654 = vmatpush2.bf16.msra.mxu1 %v3617_v42  ;;  %v3625_v42 = vld [vmem:[%s4929_s14 + $0x94] ss:$8 sps:$4 sm:$0xff]  }
 0x3ef   : > { %2655 = vmatprep.subr.bf16.mxu1 %v3622_v40 }
 0x3f2   : > { %2656 = vmatpush2.bf16.msra.mxu1 %v3620_v41 }
 0x3f3   : > { %2657 = vmatprep.subr.bf16.mxu1 %v3625_v42 }
 0x3f6   : > { %2658 = vmatpush2.bf16.msra.mxu1 %v3623_v43 }
 0x46d   : > { %v2061_v44 = vpop.f32.mrf.mxu1 }
 0x46e   : > { %v2062_v51 = vadd.f32 %v2061_v44, %v1860_v46  ;;  %v3628_v44 = vld [vmem:[%s4929_s14 + $0x84] ss:$8 sps:$4 sm:$0xff]  }
 0x46f   : > { %v2063_v47 = vpop.f32.mrf.mxu1  ;;  %2659 = vmatprep.subr.bf16.mxu1 %v3628_v44 }
 0x470   : > { %v2064_v49 = vadd.f32 %v2063_v47, %v1864_v45  ;;  %v2100_v60 = vmax.f32 %v2062_v51, 0.0 }
 0x471   : > { %v2065_v48 = vpop.f32.mrf.mxu1 }
 0x472   : > { %v2066_v50 = vadd.f32 %v2065_v48, %v1860_v46  ;;  %v2101_v57 = vmax.f32 %v2064_v49, 0.0 }
 0x473   : > { %v2067_v52 = vpop.f32.mrf.mxu1 }
 0x474   : > { %v2068_v53 = vadd.f32 %v2067_v52, %v1864_v45  ;;  %v2102_v55 = vmax.f32 %v2066_v50, 0.0 }
 0x475   : > { %v2071_v56 = vpop.f32.mrf.mxu1 }
 0x476   : > { %v2103_v59 = vmax.f32 %v2068_v53, 0.0  ;;  %v2116_v62 = vpack.c.bf16 %v2102_v55, %v2100_v60  ;;  %v2072_v2 = vadd.f32 %v2071_v56, %v1860_v46 }
 0x477   : > { %v2073_v61 = vpop.f32.mrf.mxu1 }
 0x478   : > { %v2117_v58 = vpack.c.bf16 %v2103_v59, %v2101_v57  ;;  %v2074_v0 = vadd.f32 %v2073_v61, %v1864_v45  ;;  %v2104_v10 = vmax.f32 %v2072_v2, 0.0 }
 0x479   : > { %v2075_v63 = vpop.f32.mrf.mxu1 }
 0x47a   : > { %v2076_v1 = vadd.f32 %v2075_v63, %v1860_v46  ;;  %2360 = vmatprep.mubr.bf16.mxu0 %v2117_v58  ;;  %v2105_v8 = vmax.f32 %v2074_v0, 0.0 }
 0x47b   : > { %v2077_v3 = vpop.f32.mrf.mxu1  ;;  %2361 = vmatmul.mubr.bf16.vlgmr.msra.gmra.mxu0 %v2116_v62 }
 0x47c   : > { %v2078_v4 = vadd.f32 %v2077_v3, %v1864_v45  ;;  %v2106_v5 = vmax.f32 %v2076_v1, 0.0 }
 0x47d   : > { %v2081_v6 = vpop.f32.mrf.mxu1 }
 0x47e   : > { %v2107_v9 = vmax.f32 %v2078_v4, 0.0  ;;  %v2118_v12 = vpack.c.bf16 %v2106_v5, %v2104_v10  ;;  %v2082_v16 = vadd.f32 %v2081_v6, %v1860_v46 }
 0x47f   : > { %v2083_v7 = vpop.f32.mrf.mxu1 }
 0x480   : > { %v2119_v11 = vpack.c.bf16 %v2107_v9, %v2105_v8  ;;  %v2084_v14 = vadd.f32 %v2083_v7, %v1864_v45  ;;  %v2108_v24 = vmax.f32 %v2082_v16, 0.0 }
 0x481   : > { %v2085_v13 = vpop.f32.mrf.mxu1 }
 0x482   : > { %v2086_v15 = vadd.f32 %v2085_v13, %v1860_v46  ;;  %2370 = vmatprep.mubr.bf16.mxu0 %v2119_v11  ;;  %v2109_v22 = vmax.f32 %v2084_v14, 0.0 }
 0x483   : > { %v2087_v17 = vpop.f32.mrf.mxu1  ;;  %2371 = vmatmul.mubr.bf16.gmra.mxu0 %v2118_v12 }
 0x484   : > { %v2088_v18 = vadd.f32 %v2087_v17, %v1864_v45  ;;  %v2110_v20 = vmax.f32 %v2086_v15, 0.0 }
 0x485   : > { %v2091_v21 = vpop.f32.mrf.mxu1 }
 0x486   : > { %v2111_v23 = vmax.f32 %v2088_v18, 0.0  ;;  %v2120_v26 = vpack.c.bf16 %v2110_v20, %v2108_v24  ;;  %v2092_v29 = vadd.f32 %v2091_v21, %v1860_v46 }
 0x487   : > { %v2093_v19 = vpop.f32.mrf.mxu1 }
 0x488   : > { %v2121_v25 = vpack.c.bf16 %v2111_v23, %v2109_v22  ;;  %v2094_v28 = vadd.f32 %v2093_v19, %v1864_v45  ;;  %v2112_v35 = vmax.f32 %v2092_v29, 0.0 }
 0x489   : > { %v2095_v27 = vpop.f32.mrf.mxu1 }
 0x48a   : > { %v2096_v54 = vadd.f32 %v2095_v27, %v1860_v46  ;;  %2380 = vmatprep.mubr.bf16.mxu0 %v2121_v25  ;;  %v2113_v33 = vmax.f32 %v2094_v28, 0.0  ;;  %v2156_v46 = vld [vmem:[%s4928_s13] sm:$0x3] }
 0x48b   : > { %v2097_v30 = vpop.f32.mrf.mxu1  ;;  %2381 = vmatmul.mubr.bf16.gmra.mxu0 %v2120_v26  ;;  %v2165_v48 = vrot.slane %v2156_v46, %v4269_v36  ;;  %v2161_v49 = vrot.slane %v2156_v46, %v4271_v37 }
 0x48c   : > { %v2098_v31 = vadd.f32 %v2097_v30, %v1864_v45  ;;  %v2114_v32 = vmax.f32 %v2096_v54, 0.0  ;;  %v3626_v45 = vld [vmem:[%s4929_s14 + $0x80] ss:$8 sps:$4 sm:$0xff]  }
 0x48d   : > { %2660 = vmatpush2.bf16.msra.mxu1 %v3626_v45 }
 0x48e   : > { %v2115_v34 = vmax.f32 %v2098_v31, 0.0  ;;  %v2122_v39 = vpack.c.bf16 %v2114_v32, %v2112_v35 }
 0x490   : > { %v2123_v38 = vpack.c.bf16 %v2115_v34, %v2113_v33 }
 0x492   : > { %2390 = vmatprep.mubr.bf16.mxu0 %v2123_v38 }
 0x493   : > { %2391 = vmatmul.mubr.bf16.gmra.mxu0 %v2122_v39 }
 0x53b   : > { %v2362_v47 = vpop.f32.mrf.mxu0 }
 0x53c   : > { %v2363_v55 = vadd.f32 %v2362_v47, %v2161_v49 }
 0x53d   : > { %v2364_v50 = vpop.f32.mrf.mxu0 }
 0x53e   : > { %v2365_v52 = vadd.f32 %v2364_v50, %v2165_v48  ;;  %v2401_v62 = vmax.f32 %v2363_v55, 0.0 }
 0x53f   : > { %v2366_v51 = vpop.f32.mrf.mxu0 }
 0x540   : > { %v2367_v53 = vadd.f32 %v2366_v51, %v2161_v49  ;;  %v2402_v61 = vmax.f32 %v2365_v52, 0.0 }
 0x541   : > { %v2368_v56 = vpop.f32.mrf.mxu0 }
 0x542   : > { %v2369_v57 = vadd.f32 %v2368_v56, %v2165_v48  ;;  %v2403_v59 = vmax.f32 %v2367_v53, 0.0 }
 0x543   : > { %v2372_v60 = vpop.f32.mrf.mxu0 }
 0x544   : > { %v2404_v58 = vmax.f32 %v2369_v57, 0.0  ;;  %v2417_v1 = vpack.c.bf16 %v2403_v59, %v2401_v62  ;;  %v2373_v5 = vadd.f32 %v2372_v60, %v2161_v49 }
 0x545   : > { %v2374_v63 = vpop.f32.mrf.mxu0 }
 0x546   : > { %v2418_v0 = vpack.c.bf16 %v2404_v58, %v2402_v61  ;;  %v2375_v3 = vadd.f32 %v2374_v63, %v2165_v48  ;;  %v2405_v12 = vmax.f32 %v2373_v5, 0.0 }
 0x547   : > { %v2376_v2 = vpop.f32.mrf.mxu0 }
 0x548   : > { %v2377_v4 = vadd.f32 %v2376_v2, %v2161_v49  ;;  %2661 = vmatprep.mubr.bf16.mxu1 %v2418_v0  ;;  %v2406_v7 = vmax.f32 %v2375_v3, 0.0 }
 0x549   : > { %v2378_v6 = vpop.f32.mrf.mxu0  ;;  %2662 = vmatmul.mubr.bf16.vlgmr.msra.gmra.mxu1 %v2417_v1 }
 0x54a   : > { %v2379_v8 = vadd.f32 %v2378_v6, %v2165_v48  ;;  %v2407_v9 = vmax.f32 %v2377_v4, 0.0 }
 0x54b   : > { %v2382_v10 = vpop.f32.mrf.mxu0 }
 0x54c   : > { %v2408_v11 = vmax.f32 %v2379_v8, 0.0  ;;  %v2419_v15 = vpack.c.bf16 %v2407_v9, %v2405_v12  ;;  %v2383_v20 = vadd.f32 %v2382_v10, %v2161_v49 }
 0x54d   : > { %v2384_v13 = vpop.f32.mrf.mxu0 }
 0x54e   : > { %v2420_v14 = vpack.c.bf16 %v2408_v11, %v2406_v7  ;;  %v2385_v17 = vadd.f32 %v2384_v13, %v2165_v48  ;;  %v2409_v26 = vmax.f32 %v2383_v20, 0.0 }
 0x54f   : > { %v2386_v16 = vpop.f32.mrf.mxu0 }
 0x550   : > { %v2387_v18 = vadd.f32 %v2386_v16, %v2161_v49  ;;  %2671 = vmatprep.mubr.bf16.mxu1 %v2420_v14  ;;  %v2410_v19 = vmax.f32 %v2385_v17, 0.0 }
 0x551   : > { %v2388_v21 = vpop.f32.mrf.mxu0  ;;  %2672 = vmatmul.mubr.bf16.gmra.mxu1 %v2419_v15 }
 0x552   : > { %v2389_v22 = vadd.f32 %v2388_v21, %v2165_v48  ;;  %v2411_v23 = vmax.f32 %v2387_v18, 0.0 }
 0x553   : > { %v2392_v24 = vpop.f32.mrf.mxu0 }
 0x554   : > { %v2412_v25 = vmax.f32 %v2389_v22, 0.0  ;;  %v2421_v54 = vpack.c.bf16 %v2411_v23, %v2409_v26  ;;  %v2393_v32 = vadd.f32 %v2392_v24, %v2161_v49 }
 0x555   : > { %v2394_v27 = vpop.f32.mrf.mxu0 }
 0x556   : > { %v2422_v28 = vpack.c.bf16 %v2412_v25, %v2410_v19  ;;  %v2395_v30 = vadd.f32 %v2394_v27, %v2165_v48  ;;  %v2413_v40 = vmax.f32 %v2393_v32, 0.0 }
 0x557   : > { %v2396_v29 = vpop.f32.mrf.mxu0 }
 0x558   : > { %v2397_v31 = vadd.f32 %v2396_v29, %v2161_v49  ;;  %2681 = vmatprep.mubr.bf16.mxu1 %v2422_v28  ;;  %v2414_v38 = vmax.f32 %v2395_v30, 0.0 }
 0x559   : > { %v2398_v33 = vpop.f32.mrf.mxu0  ;;  %2682 = vmatmul.mubr.bf16.gmra.mxu1 %v2421_v54 }
 0x55a   : > { %v2399_v34 = vadd.f32 %v2398_v33, %v2165_v48  ;;  %v2415_v35 = vmax.f32 %v2397_v31, 0.0 }
 0x55c   : > { %v2416_v39 = vmax.f32 %v2399_v34, 0.0  ;;  %v2423_v42 = vpack.c.bf16 %v2415_v35, %v2413_v40 }
 0x55e   : > { %v2424_v41 = vpack.c.bf16 %v2416_v39, %v2414_v38 }
 0x560   : > { %2691 = vmatprep.mubr.bf16.mxu1 %v2424_v41 }
 0x561   : > { %2692 = vmatmul.mubr.bf16.gmra.mxu1 %v2423_v42 }
 0x562   : > { %3722 = shalt.err (!%p3719_p3)
}
 0x563   : > { %s3723_s16 = scalar_lea.hbm %s4760_s20, 1024  ;;  %s3727_s21 = scalar_lea.hbm %s4932_s17, 2048 }
 0x564   : > { %p3724_p4 = scmp.ne.s32.totalorder %s4760_s20, %s3723_s16  ;;  %p3728_p9 = scmp.lt.s32.totalorder %s4760_s20, %s4932_s17 }
 0x565   : > { %p3729_p10 = scmp.lt.s32.totalorder %s3727_s21, %s3723_s16 }
 0x566   : > { %p3725_p7 = pnand %p3724_p4, %p3970_p5 }
 0x567   : > { %p3730_p11 = por %p3729_p10, %p3728_p9 }
 0x568   : > { %p3726_p8 = pneg %p3725_p7 }
 0x56a   : > { %p3731_p12 = pnand %p3730_p11, %p3726_p8 }
 0x56c   : > { %3734 = shalt.err (!%p3731_p12)
}
 0x56d   : > { %s4946_s4 = smov 128   ;;  %s3830_s3 = smov 8  }
 0x56e   : > { %3252 = dma.vmem_to_hbm [thread:$0]  (%p3970_p5), %s4763_s29, 1024, %s4760_s20, %s4765_s1, %s4946_s4, %s4946_s4, %s3830_s3  }
 0x56f   : > { %s4969_s22 = sshll.u32 %s4374_s23, 4  ;;  %s4970_s24 = sshll.u32 %s3951_s0, 10  ;;  %s4793_s22 = int_to_ptr.vmem [resolvable:$true] %s4969_s22 }
 0x570   : > { %s2870_s25 = scalar_lea.hbm %s4933_s18, %s4970_s24  ;;  %s3735_s21 = scalar_lea.vmem %s4793_s22, 1024 }
 0x571   : > { %p3736_p13 = scmp.ne.s32.totalorder %s4793_s22, %s3735_s21  ;;  %s3831_s27 = smov [#allocation6]  }
 0x572   : > { %s3739_s5 = sshll.u32 %s3831_s27, 4  ;;  %s3740_s5 = int_to_ptr.vmem [resolvable:$false] %s3739_s5 }
 0x573   : > { %p3737_p0 = pnand %p3736_p13, %p3970_p5  ;;  %s3741_s20 = scalar_lea.vmem %s3740_s5, 2048 }
 0x574   : > { %p3742_p2 = scmp.lt.s32.totalorder %s4793_s22, %s3740_s5  ;;  %p3743_p3 = scmp.lt.s32.totalorder %s3741_s20, %s3735_s21 }
 0x575   : > { %p3738_p1 = pneg %p3737_p0 }
 0x576   : > { %p3744_p4 = por %p3743_p3, %p3742_p2 }
 0x578   : > { %p3745_p7 = pnand %p3744_p4, %p3738_p1 }
 0x57a   : > { %3748 = shalt.err (!%p3745_p7)
}
 0x57b   : > { %s3749_s23 = scalar_lea.hbm %s2870_s25, 1024  ;;  %s3753_s16 = scalar_lea.hbm %s4933_s18, 2048 }
 0x57c   : > { %p3750_p8 = scmp.ne.s32.totalorder %s2870_s25, %s3749_s23  ;;  %p3754_p11 = scmp.lt.s32.totalorder %s2870_s25, %s4933_s18 }
 0x57d   : > { %p3755_p12 = scmp.lt.s32.totalorder %s3753_s16, %s3749_s23 }
 0x57e   : > { %p3751_p9 = pnand %p3750_p8, %p3970_p5 }
 0x57f   : > { %p3756_p13 = por %p3755_p12, %p3754_p11 }
 0x580   : > { %p3752_p10 = pneg %p3751_p9 }
 0x582   : > { %p3757_p0 = pnand %p3756_p13, %p3752_p10 }
 0x584   : > { %3760 = shalt.err (!%p3757_p0)
}
 0x585   : > { %s4971_s5 = smov 128   ;;  %v2457_v43 = vld [vmem:[%s4930_s15] sm:$0x3]  ;;  %s4972_s23 = sld [smem:[#allocation21_spill]] }
 0x586   : > { %3253 = dma.vmem_to_hbm [thread:$0]  (%p3970_p5), %s4793_s22, 1024, %s2870_s25, %s4765_s1, %s4971_s5, %s4971_s5, %s3830_s3   ;;  %v4824_v44 = vrot.slane %v2457_v43, %v4271_v37  ;;  %v4827_v45 = vrot.slane %v2457_v43, %v4269_v36 }
 0x587   : > { %s3010_s1 = sshll.u32 %s4354_s30, 7  ;;  %s3248_s3 = sshll.u32 %s3951_s0, 11 }
 0x588   : > { %s4846_s4 = scalar_lea.vmem [#allocation2], %s3010_s1  ;;  %s2815_s24 = scalar_lea.sflag [#allocation3], %s4354_s30 }
 0x589   : > { %s2839_s22 = sshll.u32 %s4846_s4, 4  ;;  %s3832_s0 = smov [#allocation2]   ;;  %s4869_s22 = int_to_ptr.vmem [resolvable:$true] %s2839_s22 }
 0x58a   : > { %s3761_s16 = scalar_lea.vmem %s4869_s22, 2048  ;;  %s3765_s19 = sshll.u32 %s3832_s0, 4  ;;  %s3766_s19 = int_to_ptr.vmem [resolvable:$false] %s3765_s19 }
 0x58b   : > { %s4867_s29 = scalar_lea.hbm %s4972_s23, %s3248_s3  ;;  %p3762_p1 = scmp.ne.s32.totalorder %s4869_s22, %s3761_s16 }
 0x58c   : > { %s3767_s5 = scalar_lea.vmem %s3766_s19, 4096  ;;  %p3768_p4 = scmp.lt.s32.totalorder %s4869_s22, %s3766_s19 }
 0x58d   : > { %p3763_p2 = pnand %p3762_p1, %p3970_p5  ;;  %p3769_p7 = scmp.lt.s32.totalorder %s3767_s5, %s3761_s16 }
 0x58f   : > { %p3764_p3 = pneg %p3763_p2  ;;  %p3770_p8 = por %p3769_p7, %p3768_p4 }
 0x591   : > { %p3771_p9 = pnand %p3770_p8, %p3764_p3 }
 0x609   : > { %v2663_v46 = vpop.f32.mrf.mxu1 }
 0x60a   : > { %v2664_v47 = vadd.f32 %v2663_v46, %v4824_v44 }
 0x60b   : > { %v2665_v48 = vpop.f32.mrf.mxu1 }
 0x60c   : > { %v2702_v49 = vsub.f32 0.0, %v2664_v47  ;;  %v2666_v50 = vadd.f32 %v2665_v48, %v4827_v45 }
 0x60d   : > { %v2667_v51 = vpop.f32.mrf.mxu1 }
 0x60e   : > { %v2718_v52 = vmul.f32 1.442695, %v2702_v49  ;;  %v2703_v53 = vsub.f32 0.0, %v2666_v50  ;;  %v2668_v55 = vadd.f32 %v2667_v51, %v4824_v44 }
 0x60f   : > { %v2669_v56 = vpop.f32.mrf.mxu1 }
 0x610   : > { %3645 = vpow2.f32 %v2718_v52  ;;  %v2720_v57 = vmul.f32 1.442695, %v2703_v53  ;;  %v2704_v37 = vsub.f32 0.0, %v2668_v55  ;;  %v2670_v59 = vadd.f32 %v2669_v56, %v4827_v45 }
 0x611   : > { %v2673_v36 = vpop.f32.mrf.mxu1 }
 0x612   : > { %3647 = vpow2.f32 %v2720_v57  ;;  %v2722_v60 = vmul.f32 1.442695, %v2704_v37  ;;  %v2705_v61 = vsub.f32 0.0, %v2670_v59  ;;  %v2674_v58 = vadd.f32 %v2673_v36, %v4824_v44 }
 0x613   : > { %v2675_v62 = vpop.f32.mrf.mxu1 }
 0x614   : > { %3649 = vpow2.f32 %v2722_v60  ;;  %v2724_v63 = vmul.f32 1.442695, %v2705_v61  ;;  %v2706_v0 = vsub.f32 0.0, %v2674_v58  ;;  %v2676_v1 = vadd.f32 %v2675_v62, %v4827_v45 }
 0x615   : > { %v2677_v2 = vpop.f32.mrf.mxu1 }
 0x616   : > { %3651 = vpow2.f32 %v2724_v63  ;;  %v2726_v3 = vmul.f32 1.442695, %v2706_v0  ;;  %v2707_v4 = vsub.f32 0.0, %v2676_v1  ;;  %v2678_v5 = vadd.f32 %v2677_v2, %v4824_v44 }
 0x617   : > { %v2679_v6 = vpop.f32.mrf.mxu1 }
 0x618   : > { %3653 = vpow2.f32 %v2726_v3  ;;  %v2728_v8 = vmul.f32 1.442695, %v2707_v4  ;;  %v2708_v9 = vsub.f32 0.0, %v2678_v5  ;;  %v2680_v10 = vadd.f32 %v2679_v6, %v4827_v45 }
 0x619   : > { %v2683_v7 = vpop.f32.mrf.mxu1 }
 0x61a   : > { %3655 = vpow2.f32 %v2728_v8  ;;  %v2730_v11 = vmul.f32 1.442695, %v2708_v9  ;;  %v2709_v12 = vsub.f32 0.0, %v2680_v10  ;;  %v2684_v13 = vadd.f32 %v2683_v7, %v4824_v44 }
 0x61b   : > { %v2685_v14 = vpop.f32.mrf.mxu1 }
 0x61c   : > { %3657 = vpow2.f32 %v2730_v11  ;;  %v2732_v15 = vmul.f32 1.442695, %v2709_v12  ;;  %v2710_v16 = vsub.f32 0.0, %v2684_v13  ;;  %v2686_v17 = vadd.f32 %v2685_v14, %v4827_v45 }
 0x61d   : > { %v3646_v18 = vpop.eup %3645  ;;  %v2687_v20 = vpop.f32.mrf.mxu1 }
 0x61e   : > { %v2750_v21 = vadd.f32 1.0, %v3646_v18  ;;  %3659 = vpow2.f32 %v2732_v15  ;;  %v2734_v22 = vmul.f32 1.442695, %v2710_v16  ;;  %v2711_v23 = vsub.f32 0.0, %v2686_v17 }
 0x61f   : > { %v3648_v24 = vpop.eup %3647  ;;  %v2688_v19 = vadd.f32 %v2687_v20, %v4824_v44  ;;  %v2689_v25 = vpop.f32.mrf.mxu1 }
 0x620   : > { %3661 = vrcp.f32 %v2750_v21  ;;  %v2751_v26 = vadd.f32 1.0, %v3648_v24  ;;  %v2736_v27 = vmul.f32 1.442695, %v2711_v23  ;;  %v2690_v28 = vadd.f32 %v2689_v25, %v4827_v45 }
 0x621   : > { %v3650_v54 = vpop.eup %3649  ;;  %3663 = vpow2.f32 %v2734_v22  ;;  %v2712_v29 = vsub.f32 0.0, %v2688_v19  ;;  %v2693_v30 = vpop.f32.mrf.mxu1 }
 0x622   : > { %3665 = vrcp.f32 %v2751_v26  ;;  %v2752_v31 = vadd.f32 1.0, %v3650_v54  ;;  %v2713_v32 = vsub.f32 0.0, %v2690_v28  ;;  %v2694_v33 = vadd.f32 %v2693_v30, %v4824_v44 }
 0x623   : > { %v3652_v34 = vpop.eup %3651  ;;  %3667 = vpow2.f32 %v2736_v27  ;;  %v2738_v35 = vmul.f32 1.442695, %v2712_v29  ;;  %v2695_v38 = vpop.f32.mrf.mxu1 }
 0x624   : > { %3669 = vrcp.f32 %v2752_v31  ;;  %v2753_v39 = vadd.f32 1.0, %v3652_v34  ;;  %v2740_v40 = vmul.f32 1.442695, %v2713_v32  ;;  %v2714_v41 = vsub.f32 0.0, %v2694_v33 }
 0x625   : > { %v3654_v42 = vpop.eup %3653  ;;  %3671 = vpow2.f32 %v2738_v35  ;;  %v2696_v43 = vadd.f32 %v2695_v38, %v4827_v45  ;;  %v2697_v46 = vpop.f32.mrf.mxu1 }
 0x626   : > { %3673 = vrcp.f32 %v2753_v39  ;;  %v2754_v47 = vadd.f32 1.0, %v3654_v42  ;;  %v2742_v48 = vmul.f32 1.442695, %v2714_v41  ;;  %v2698_v49 = vadd.f32 %v2697_v46, %v4824_v44 }
 0x627   : > { %v3656_v50 = vpop.eup %3655  ;;  %3675 = vpow2.f32 %v2740_v40  ;;  %v2715_v51 = vsub.f32 0.0, %v2696_v43  ;;  %v2699_v52 = vpop.f32.mrf.mxu1 }
 0x628   : > { %3677 = vrcp.f32 %v2754_v47  ;;  %v2755_v53 = vadd.f32 1.0, %v3656_v50  ;;  %v2716_v55 = vsub.f32 0.0, %v2698_v49  ;;  %v2700_v56 = vadd.f32 %v2699_v52, %v4827_v45 }
 0x629   : > { %v3658_v57 = vpop.eup %3657  ;;  %3679 = vpow2.f32 %v2742_v48  ;;  %v2744_v37 = vmul.f32 1.442695, %v2715_v51 }
 0x62a   : > { %3681 = vrcp.f32 %v2755_v53  ;;  %v2756_v59 = vadd.f32 1.0, %v3658_v57  ;;  %v2746_v36 = vmul.f32 1.442695, %v2716_v55  ;;  %v2717_v60 = vsub.f32 0.0, %v2700_v56 }
 0x62b   : > { %v3660_v61 = vpop.eup %3659  ;;  %3683 = vpow2.f32 %v2744_v37 }
 0x62c   : > { %3685 = vrcp.f32 %v2756_v59  ;;  %v2757_v44 = vadd.f32 1.0, %v3660_v61  ;;  %v2748_v58 = vmul.f32 1.442695, %v2717_v60 }
 0x62d   : > { %v3662_v62 = vpop.eup %3661  ;;  %3687 = vpow2.f32 %v2746_v36 }
 0x62e   : > { %v3664_v63 = vpop.eup %3663  ;;  %2798 = vst [vmem:[%s4846_s4] sm:$0xff] %v3662_v62  ;;  %3689 = vrcp.f32 %v2757_v44 }
 0x62f   : > { %v3666_v45 = vpop.eup %3665  ;;  %v2758_v0 = vadd.f32 1.0, %v3664_v63  ;;  %3691 = vpow2.f32 %v2748_v58 }
 0x630   : > { %v3668_v1 = vpop.eup %3667  ;;  %2799 = vst [vmem:[%s4846_s4 + $0x8] sm:$0xff] %v3666_v45 }
 0x631   : > { %v3670_v2 = vpop.eup %3669  ;;  %3693 = vrcp.f32 %v2758_v0  ;;  %v2759_v3 = vadd.f32 1.0, %v3668_v1 }
 0x632   : > { %v3672_v4 = vpop.eup %3671  ;;  %2800 = vst [vmem:[%s4846_s4 + $0x10] sm:$0xff] %v3670_v2 }
 0x633   : > { %v3674_v5 = vpop.eup %3673  ;;  %3695 = vrcp.f32 %v2759_v3  ;;  %v2760_v6 = vadd.f32 1.0, %v3672_v4 }
 0x634   : > { %v3676_v8 = vpop.eup %3675  ;;  %2801 = vst [vmem:[%s4846_s4 + $0x18] sm:$0xff] %v3674_v5 }
 0x635   : > { %v3678_v9 = vpop.eup %3677  ;;  %3697 = vrcp.f32 %v2760_v6  ;;  %v2761_v10 = vadd.f32 1.0, %v3676_v8 }
 0x636   : > { %v3680_v7 = vpop.eup %3679  ;;  %2802 = vst [vmem:[%s4846_s4 + $0x20] sm:$0xff] %v3678_v9 }
 0x637   : > { %v3682_v11 = vpop.eup %3681  ;;  %3699 = vrcp.f32 %v2761_v10  ;;  %v2762_v12 = vadd.f32 1.0, %v3680_v7 }
 0x638   : > { %v3684_v13 = vpop.eup %3683  ;;  %2803 = vst [vmem:[%s4846_s4 + $0x28] sm:$0xff] %v3682_v11 }
 0x639   : > { %v3686_v14 = vpop.eup %3685  ;;  %3701 = vrcp.f32 %v2762_v12  ;;  %v2763_v15 = vadd.f32 1.0, %v3684_v13 }
 0x63a   : > { %v3688_v16 = vpop.eup %3687  ;;  %2804 = vst [vmem:[%s4846_s4 + $0x30] sm:$0xff] %v3686_v14 }
 0x63b   : > { %v3690_v17 = vpop.eup %3689  ;;  %3703 = vrcp.f32 %v2763_v15  ;;  %v2764_v18 = vadd.f32 1.0, %v3688_v16 }
 0x63c   : > { %v3692_v20 = vpop.eup %3691  ;;  %2805 = vst [vmem:[%s4846_s4 + $0x38] sm:$0xff] %v3690_v17 }
 0x63d   : > { %3705 = vrcp.f32 %v2764_v18  ;;  %v2765_v21 = vadd.f32 1.0, %v3692_v20 }
 0x63e   : > { %v3694_v22 = vpop.eup %3693 }
 0x63f   : > { %2806 = vst [vmem:[%s4846_s4 + $0x40] sm:$0xff] %v3694_v22  ;;  %3707 = vrcp.f32 %v2765_v21 }
 0x640   : > { %v3696_v23 = vpop.eup %3695 }
 0x641   : > { %2807 = vst [vmem:[%s4846_s4 + $0x48] sm:$0xff] %v3696_v23 }
 0x642   : > { %v3698_v24 = vpop.eup %3697 }
 0x643   : > { %2808 = vst [vmem:[%s4846_s4 + $0x50] sm:$0xff] %v3698_v24 }
 0x644   : > { %v3700_v19 = vpop.eup %3699 }
 0x645   : > { %2809 = vst [vmem:[%s4846_s4 + $0x58] sm:$0xff] %v3700_v19 }
 0x646   : > { %v3702_v25 = vpop.eup %3701 }
 0x647   : > { %2810 = vst [vmem:[%s4846_s4 + $0x60] sm:$0xff] %v3702_v25 }
 0x648   : > { %v3704_v26 = vpop.eup %3703 }
 0x649   : > { %2811 = vst [vmem:[%s4846_s4 + $0x68] sm:$0xff] %v3704_v26 }
 0x64a   : > { %v3706_v27 = vpop.eup %3705 }
 0x64b   : > { %2812 = vst [vmem:[%s4846_s4 + $0x70] sm:$0xff] %v3706_v27 }
 0x64c   : > { %v3708_v28 = vpop.eup %3707 }
 0x64d   : > { %2813 = vst [vmem:[%s4846_s4 + $0x78] sm:$0xff] %v3708_v28 }
 0x64e   : > { %3774 = shalt.err (!%p3771_p9)
}
 0x64f   : > { %s3775_s21 = scalar_lea.hbm %s4867_s29, 2048  ;;  %s3779_s4 = scalar_lea.hbm %s4972_s23, 4096 }
 0x650   : > { %p3776_p10 = scmp.ne.s32.totalorder %s4867_s29, %s3775_s21  ;;  %p3780_p13 = scmp.lt.s32.totalorder %s4867_s29, %s4972_s23 }
 0x651   : > { %p3781_p0 = scmp.lt.s32.totalorder %s3779_s4, %s3775_s21 }
 0x652   : > { %p3777_p11 = pnand %p3776_p10, %p3970_p5 }
 0x653   : > { %p3782_p1 = por %p3781_p0, %p3780_p13 }
 0x654   : > { %p3778_p12 = pneg %p3777_p11 }
 0x656   : > { %p3783_p2 = pnand %p3782_p1, %p3778_p12 }
 0x658   : > { %3786 = shalt.err (!%p3783_p2)
}
 0x659   : > { %s3833_s20 = smov 256   ;;  %s3834_s16 = smov 16  }
 0x65a   : > { %3251 = dma.vmem_to_hbm [thread:$0]  (%p3970_p5), %s4869_s22, 2048, %s4867_s29, %s2815_s24, %s3833_s20, %s3833_s20, %s3834_s16  }
 0x65b PF: > { %s4973_s0 = sld [smem:[#allocation11_spill]] }
 0x65c   : > { %s4974_s19 = sld [smem:[#allocation9_spill]] }
 0x661   : > { %p3267_p3 = scmp.ge.s32.totalorder %s4973_s0, 2 }
 0x662   : > { %s2886_s27 = sand.u32 1, %s4974_s19  }
 0x663   : > { %p3258_p4 = pnand %p3267_p3, %p3974_p6  ;;  %s2887_s21 = scalar_lea.sflag [#allocation3], %s2886_s27 }
 0x665   : > { %p3259_p7 = pneg %p3258_p4 }
 0x667   : > { %3804 = dma.done.wait (%p3259_p7), %s2887_s21, 2048  }
 0x668   : > { %3806 = vsyncadd (%p3259_p7), %s2887_s21, 4294965248  ;;  %s4976_s1 = sadd.s32 4294967294, %s4973_s0  }
 0x669   : > { %s2895_s4 = sand.u32 1, %s4976_s1  }
 0x66a   : > { %s2896_s3 = scalar_lea.sflag [#allocation5], %s2895_s4 }
 0x66b   : > { %3808 = dma.done.wait (%p3259_p7), %s2896_s3, 2048  }
 0x66c   : > { %3810 = vsyncadd (%p3259_p7), %s2896_s3, 4294965248  ;;  %s4977_s30 = sld [smem:[#allocation12_spill]]  ;;  %s4980_s27 = smov %s3817_s28 }
 0x66d   : > { %s4978_s2 = sld [smem:[#allocation10_spill]] }
 0x66e   : > { %s4979_s29 = sld [smem:[#allocation13_spill]] }
 0x672   : > { %p32_p5 = scmp.ge.s32.totalorder %s4977_s30, 4  }
 0x673   : > { %s4981_s28 = smov %s4978_s2 }
 0x674   :  { %34 = sbr.rel (!%p32_p5) target bundleno = 13 (0xd), region = 154 }
 0x679   :  { %2910 = vsyncpa [#allocation3], 1 }
 0x67a   :  { %2912 = vsyncpa [#allocation3 + $0x1], 1 }
 0x67b   :  { %2913 = vsyncpa [#allocation5], 1 }
 0x67c   :  { %2915 = vsyncpa [#allocation5 + $0x1], 1 }

</bundles_post_ra>
